<compile_context>
chip_gen: v7x
topology: tpu7x:2x2x1
jax: 0.10.0
libtpu: 0.0.40
codegen_flags: <defaults>
</compile_context>

<pallas_src>
import functools

import jax
import jax.numpy as jnp
from jax.experimental import pallas as pl
from jax.experimental.pallas import tpu as pltpu

ROW_TILE = 512      # row tile for head / softmax / CE kernels (memory-bound: big tiles -> near roofline)
PROTO_TILE = 256    # prototype-axis (K) tile; raise to 1024-2048 at production prototype counts (65k)


def _vmem_limit():
    # ~24 MiB headroom for Mosaic internal scratch: ~40 MiB on v7x (64 MiB), ~104 MiB on v5e/v6e (128 MiB).
    try:
        cap = int(pltpu.get_tpu_info().vmem_capacity_bytes)
        return max(32 * 1024 * 1024, cap - 24 * 1024 * 1024)
    except Exception:
        return 48 * 1024 * 1024


VMEM_LIMIT = _vmem_limit()


def _cp(*sems):
    return pltpu.CompilerParams(dimension_semantics=sems, vmem_limit_bytes=VMEM_LIMIT)


def _row_blocks(n, tile=ROW_TILE):
    # n <= tile: one full block (full dims are always layout-legal, no padding copy needed).
    # n  > tile: cdiv grid; OOB tail rows read garbage / skip writes, all kernels are row-independent.
    if n <= tile:
        return n, 1
    return tile, pl.cdiv(n, tile)


def _pick_img_tile(n_imgs, patches, target_rows=ROW_TILE):
    cap = max(1, target_rows // max(patches, 1))
    for t in range(min(n_imgs, cap), 0, -1):
        if n_imgs % t == 0 and (t * patches) % 8 == 0 and (t % 8 == 0 or t == n_imgs):
            return t
    return n_imgs  # single full block fallback (always layout-legal)


# ----------------------------------------------------------------------------
# In-kernel math helpers
# ----------------------------------------------------------------------------
def _erf(x):
    # Abramowitz & Stegun 7.1.26 (max abs err ~1.5e-7) -> exact-GELU semantics within f32 tolerance.
    a1, a2, a3, a4, a5 = 0.254829592, -0.284496736, 1.421413741, -1.453152027, 1.061405429
    p = 0.3275911
    sgn = jnp.where(x >= 0.0, 1.0, -1.0)
    ax = jnp.abs(x)
    t = 1.0 / (1.0 + p * ax)
    poly = t * (a1 + t * (a2 + t * (a3 + t * (a4 + t * a5))))
    return sgn * (1.0 - poly * jnp.exp(-ax * ax))


def _gelu(x):
    # PyTorch nn.GELU() default = exact erf-based GELU.
    return 0.5 * x * (1.0 + _erf(x * 0.7071067811865476))


# ----------------------------------------------------------------------------
# Pallas kernels
# ----------------------------------------------------------------------------
def patch_embed_ln_kernel(x_ref, m_ref, w_ref, b_ref, mt_ref, cls_ref, g_ref, beta_ref,
                          tok_ref, cls_out_ref, *, img_tile, patches):
    # x_ref: (img_tile*patches, Cin) bf16 pixel patches; m_ref: (rows, 1) f32 iBOT mask (0/1).
    # outputs: tok_ref (rows, D) bf16 LayerNorm'd patch tokens; cls_out_ref (img_tile, D) f32 LN'd cls.
    emb = jnp.dot(x_ref[...], w_ref[...], preferred_element_type=jnp.float32) + b_ref[...]
    m = m_ref[...]
    emb = emb * (1.0 - m) + mt_ref[...] * m          # iBOT mask-token select (exact 0/1 blend)

    # per-image mean of pre-LN (masked) embeddings via sublane-axis sums (no MXU, no iota/compare)
    inv_p = 1.0 / float(patches)
    pooled = [jnp.sum(emb[i * patches:(i + 1) * patches, :], axis=0, keepdims=True) * inv_p
              for i in range(img_tile)]
    cls = cls_ref[...] + jnp.concatenate(pooled, axis=0)        # (img_tile, D)
    mu_c = jnp.mean(cls, axis=-1, keepdims=True)
    var_c = jnp.mean((cls - mu_c) ** 2, axis=-1, keepdims=True)
    cls_out_ref[...] = (cls - mu_c) * jax.lax.rsqrt(var_c + 1e-6) * g_ref[...] + beta_ref[...]

    # fused LayerNorm epilogue on patch tokens -> bf16 (saves an extra HBM round trip of the tokens)
    mu = jnp.mean(emb, axis=-1, keepdims=True)
    var = jnp.mean((emb - mu) ** 2, axis=-1, keepdims=True)
    tok = (emb - mu) * jax.lax.rsqrt(var + 1e-6) * g_ref[...] + beta_ref[...]
    tok_ref[...] = tok.astype(tok_ref.dtype)


def dino_mlp_kernel(x_ref, w1_ref, b1_ref, w2_ref, b2_ref, w3_ref, b3_ref, o_ref):
    # 3-layer MLP (exact GELU) + L2 normalize; bf16 MXU inputs, f32 accumulation; bf16 output.
    h = jnp.dot(x_ref[...], w1_ref[...], preferred_element_type=jnp.float32) + b1_ref[...]
    h = _gelu(h)
    h = jnp.dot(h.astype(jnp.bfloat16), w2_ref[...], preferred_element_type=jnp.float32) + b2_ref[...]
    h = _gelu(h)
    h = jnp.dot(h.astype(jnp.bfloat16), w3_ref[...], preferred_element_type=jnp.float32) + b3_ref[...]
    # F.normalize(dim=-1, eps=1e-12) as rsqrt-multiply
    ss = jnp.sum(h * h, axis=-1, keepdims=True)
    o_ref[...] = (h * jax.lax.rsqrt(jnp.maximum(ss, 1e-24))).astype(o_ref.dtype)


def proto_logits_lse_kernel(h_ref, wl_ref, c_ref, logits_ref, lse_ref, m_sc, l_sc, *, inv_temp):
    # Teacher: prototype projection tiled over K + online LSE of the centered/tempered logits.
    # logits are written once (bf16); the LSE is computed on the same bf16-rounded values so that the
    # normalize pass produces probabilities that sum to 1 exactly (up to f32 exp error).
    k = pl.program_id(1)

    @pl.when(k == 0)
    def _():
        m_sc[...] = jnp.full_like(m_sc, -jnp.inf)
        l_sc[...] = jnp.zeros_like(l_sc)

    logits = jnp.dot(h_ref[...], wl_ref[...], preferred_element_type=jnp.float32)
    logits_bf = logits.astype(jnp.bfloat16)
    logits_ref[...] = logits_bf
    z = (logits_bf.astype(jnp.float32) - c_ref[...]) * inv_temp
    m_new = jnp.maximum(m_sc[...], jnp.max(z, axis=-1, keepdims=True))
    l_sc[...] = jnp.exp(m_sc[...] - m_new) * l_sc[...] + jnp.sum(jnp.exp(z - m_new), axis=-1, keepdims=True)
    m_sc[...] = m_new

    @pl.when(k == pl.num_programs(1) - 1)
    def _():
        lse = m_sc[...] + jnp.log(l_sc[...])                    # (rows, 1)
        lse_ref[...] = jnp.broadcast_to(lse, lse_ref.shape)     # lane-full (rows, 128) store


def softmax_center_norm_kernel(logits_ref, c_ref, lse_ref, o_ref, *, inv_temp):
    # Teacher centered softmax, K-tiled: probs = exp((x - c)/T - lse); exact normalization.
    z = (logits_ref[...].astype(jnp.float32) - c_ref[...]) * inv_temp
    o_ref[...] = jnp.exp(z - lse_ref[:, 0:1])


def proto_ce_kernel(h_ref, wl_ref, t_ref, o_ref, m_sc, l_sc, ts_sc, tw_sc, *, inv_temp):
    # Student: prototype projection + online LSE + cross-entropy fused; the (n, K) student logits never
    # leave VMEM.  ce_row = sum_k t*s - (sum_k t) * logsumexp(s), with s = logits / student_temp.
    k = pl.program_id(1)

    @pl.when(k == 0)
    def _():
        m_sc[...] = jnp.full_like(m_sc, -jnp.inf)
        l_sc[...] = jnp.zeros_like(l_sc)
        ts_sc[...] = jnp.zeros_like(ts_sc)
        tw_sc[...] = jnp.zeros_like(tw_sc)

    s = jnp.dot(h_ref[...], wl_ref[...], preferred_element_type=jnp.float32) * inv_temp
    t = t_ref[...].astype(jnp.float32)
    m_new = jnp.maximum(m_sc[...], jnp.max(s, axis=-1, keepdims=True))
    l_sc[...] = jnp.exp(m_sc[...] - m_new) * l_sc[...] + jnp.sum(jnp.exp(s - m_new), axis=-1, keepdims=True)
    m_sc[...] = m_new
    ts_sc[...] += jnp.sum(t * s, axis=-1, keepdims=True)
    tw_sc[...] += jnp.sum(t, axis=-1, keepdims=True)

    @pl.when(k == pl.num_programs(1) - 1)
    def _():
        lse = m_sc[...] + jnp.log(l_sc[...])
        ce = ts_sc[...] - tw_sc[...] * lse                      # (rows, 1)
        o_ref[...] = jnp.broadcast_to(ce, o_ref.shape)          # lane-full (rows, 128) store


# ----------------------------------------------------------------------------
# Pallas wrappers
# ----------------------------------------------------------------------------
def patch_embed_ln(bp, x_rows, mask_rows, n_imgs, patches):
    rows, cin = x_rows.shape
    d = bp["w_embed"].shape[1]
    img_tile = _pick_img_tile(n_imgs, patches)
    rt = img_tile * patches
    kern = functools.partial(patch_embed_ln_kernel, img_tile=img_tile, patches=patches)
    toks, cls = pl.pallas_call(
        kern,
        out_shape=(jax.ShapeDtypeStruct((rows, d), jnp.bfloat16),
                   jax.ShapeDtypeStruct((n_imgs, d), jnp.float32)),
        grid=(n_imgs // img_tile,),
        in_specs=[
            pl.BlockSpec((rt, cin), lambda i: (i, 0)),
            pl.BlockSpec((rt, 1), lambda i: (i, 0)),
            pl.BlockSpec((cin, d), lambda i: (0, 0)),
            pl.BlockSpec((1, d), lambda i: (0, 0)),
            pl.BlockSpec((1, d), lambda i: (0, 0)),
            pl.BlockSpec((1, d), lambda i: (0, 0)),
            pl.BlockSpec((1, d), lambda i: (0, 0)),
            pl.BlockSpec((1, d), lambda i: (0, 0)),
        ],
        out_specs=(pl.BlockSpec((rt, d), lambda i: (i, 0)),
                   pl.BlockSpec((img_tile, d), lambda i: (i, 0))),
        compiler_params=_cp("parallel"),
    )(x_rows.astype(jnp.bfloat16), mask_rows, bp["w_embed"], bp["b_embed"],
      bp["mask_token"], bp["cls_token"], bp["ln_g"], bp["ln_b"])
    return cls, toks


def dino_mlp(hp, x):
    n, d = x.shape
    hid = hp["w1"].shape[1]
    bott = hp["w3"].shape[1]
    tile, nblk = _row_blocks(n)
    return pl.pallas_call(
        dino_mlp_kernel,
        out_shape=jax.ShapeDtypeStruct((n, bott), jnp.bfloat16),
        grid=(nblk,),
        in_specs=[
            pl.BlockSpec((tile, d), lambda i: (i, 0)),
            pl.BlockSpec((d, hid), lambda i: (0, 0)),
            pl.BlockSpec((1, hid), lambda i: (0, 0)),
            pl.BlockSpec((hid, hid), lambda i: (0, 0)),
            pl.BlockSpec((1, hid), lambda i: (0, 0)),
            pl.BlockSpec((hid, bott), lambda i: (0, 0)),
            pl.BlockSpec((1, bott), lambda i: (0, 0)),
        ],
        out_specs=pl.BlockSpec((tile, bott), lambda i: (i, 0)),
        compiler_params=_cp("parallel"),
    )(x.astype(jnp.bfloat16), hp["w1"], hp["b1"], hp["w2"], hp["b2"], hp["w3"], hp["b3"])


def teacher_proto_softmax_center(wl, h, center, temp):
    # returns (raw logits bf16 (needed for the center EMA), exactly-normalized centered softmax f32)
    n, bott = h.shape
    k = wl.shape[1]
    tile, nblk = _row_blocks(n)
    kt = min(k, PROTO_TILE)
    assert k % kt == 0
    nk = k // kt
    inv_t = 1.0 / float(temp)

    logits, lse = pl.pallas_call(
        functools.partial(proto_logits_lse_kernel, inv_temp=inv_t),
        out_shape=(jax.ShapeDtypeStruct((n, k), jnp.bfloat16),
                   jax.ShapeDtypeStruct((n, 128), jnp.float32)),
        grid=(nblk, nk),
        in_specs=[pl.BlockSpec((tile, bott), lambda i, j: (i, 0)),   # h resident across the K sweep
                  pl.BlockSpec((bott, kt), lambda i, j: (0, j)),
                  pl.BlockSpec((1, kt), lambda i, j: (0, j))],
        out_specs=(pl.BlockSpec((tile, kt), lambda i, j: (i, j)),
                   pl.BlockSpec((tile, 128), lambda i, j: (i, 0))),
        scratch_shapes=[pltpu.VMEM((tile, 1), jnp.float32),
                        pltpu.VMEM((tile, 1), jnp.float32)],
        compiler_params=_cp("parallel", "arbitrary"),
    )(h, wl, center)

    probs = pl.pallas_call(
        functools.partial(softmax_center_norm_kernel, inv_temp=inv_t),
        out_shape=jax.ShapeDtypeStruct((n, k), jnp.float32),
        grid=(nblk, nk),
        in_specs=[pl.BlockSpec((tile, kt), lambda i, j: (i, j)),
                  pl.BlockSpec((1, kt), lambda i, j: (0, j)),
                  pl.BlockSpec((tile, 128), lambda i, j: (i, 0))],
        out_specs=pl.BlockSpec((tile, kt), lambda i, j: (i, j)),
        compiler_params=_cp("parallel", "parallel"),
    )(logits, center, lse)
    return logits, probs


def student_proto_ce(wl, h, teacher_probs, student_temp):
    # fused projection + online-LSE + CE; returns per-row sum(t * log_softmax(logits / student_temp)).
    n, bott = h.shape
    k = wl.shape[1]
    tile, nblk = _row_blocks(n)
    kt = min(k, PROTO_TILE)
    assert k % kt == 0
    nk = k // kt
    out = pl.pallas_call(
        functools.partial(proto_ce_kernel, inv_temp=1.0 / float(student_temp)),
        out_shape=jax.ShapeDtypeStruct((n, 128), jnp.float32),
        grid=(nblk, nk),
        in_specs=[pl.BlockSpec((tile, bott), lambda i, j: (i, 0)),   # h resident across the K sweep
                  pl.BlockSpec((bott, kt), lambda i, j: (0, j)),
                  pl.BlockSpec((tile, kt), lambda i, j: (i, j))],
        out_specs=pl.BlockSpec((tile, 128), lambda i, j: (i, 0)),
        scratch_shapes=[pltpu.VMEM((tile, 1), jnp.float32),
                        pltpu.VMEM((tile, 1), jnp.float32),
                        pltpu.VMEM((tile, 1), jnp.float32),
                        pltpu.VMEM((tile, 1), jnp.float32)],
        compiler_params=_cp("parallel", "arbitrary"),
    )(h, wl, teacher_probs)
    return out[:, 0]


# ----------------------------------------------------------------------------
# Parameter init (deterministic, synthetic); matmul weights stored in bf16
# ----------------------------------------------------------------------------
def init_backbone(key, in_dim, embed_dim):
    ks = jax.random.split(key, 3)
    return dict(
        w_embed=(0.02 * jax.random.normal(ks[0], (in_dim, embed_dim), jnp.float32)).astype(jnp.bfloat16),
        b_embed=jnp.zeros((1, embed_dim), jnp.float32),
        cls_token=0.02 * jax.random.normal(ks[1], (1, embed_dim), jnp.float32),
        mask_token=0.02 * jax.random.normal(ks[2], (1, embed_dim), jnp.float32),
        ln_g=jnp.ones((1, embed_dim), jnp.float32),
        ln_b=jnp.zeros((1, embed_dim), jnp.float32),
    )


def init_dino_head(key, in_dim, hidden_dim, bottleneck_dim, out_dim):
    ks = jax.random.split(key, 4)
    v = 0.02 * jax.random.normal(ks[3], (out_dim, bottleneck_dim), jnp.float32)
    # weight_norm with weight_g fixed to 1 -> effective row-normalized weight (bf16 cast drifts ~1e-3)
    wl = (v / jnp.linalg.norm(v, axis=1, keepdims=True)).T  # (bottleneck, out)
    return dict(
        w1=(0.02 * jax.random.normal(ks[0], (in_dim, hidden_dim), jnp.float32)).astype(jnp.bfloat16),
        b1=jnp.zeros((1, hidden_dim), jnp.float32),
        w2=(0.02 * jax.random.normal(ks[1], (hidden_dim, hidden_dim), jnp.float32)).astype(jnp.bfloat16),
        b2=jnp.zeros((1, hidden_dim), jnp.float32),
        w3=(0.02 * jax.random.normal(ks[2], (hidden_dim, bottleneck_dim), jnp.float32)).astype(jnp.bfloat16),
        b3=jnp.zeros((1, bottleneck_dim), jnp.float32),
        wl=wl.astype(jnp.bfloat16),
    )


# ----------------------------------------------------------------------------
# Backbone stand-in (fused patch embed + mask select + LayerNorm + cls LN)
# ----------------------------------------------------------------------------
def backbone_fwd(bp, crops_nchw, masks=None, patch_size=8):
    n, c, h, w = crops_nchw.shape
    ph, pw = h // patch_size, w // patch_size
    p = ph * pw
    d = bp["w_embed"].shape[1]
    x = crops_nchw.reshape(n, c, ph, patch_size, pw, patch_size)
    x = jnp.transpose(x, (0, 2, 4, 1, 3, 5)).reshape(n * p, c * patch_size * patch_size)
    if masks is None:
        mask_rows = jnp.zeros((n * p, 1), jnp.float32)
    else:
        mask_rows = masks.astype(jnp.float32).reshape(n * p, 1)
    cls, toks = patch_embed_ln(bp, x, mask_rows, n, p)
    # TODO(synk): transformer blocks of the real ViT backbone omitted; cls token is a learned token mixed
    #             with mean-pooled (masked) patch embeddings, LayerNorm'd inside the kernel.
    return cls, toks.reshape(n, p, d)  # x_norm_clstoken (f32), x_norm_patchtokens (bf16)


# ----------------------------------------------------------------------------
# KoLeo loss (plain JAX glue; tiny)
# ----------------------------------------------------------------------------
def koleo_loss(x, eps=1e-8):
    xn = x / jnp.maximum(jnp.linalg.norm(x, axis=-1, keepdims=True), eps)
    dots = xn @ xn.T
    n = xn.shape[0]
    dots = jnp.where(jnp.eye(n, dtype=bool), -1.0, dots)
    nn_idx = jnp.argmax(dots, axis=1)
    diff = xn - xn[nn_idx] + eps
    dist = jnp.sqrt(jnp.sum(diff * diff, axis=-1))
    return -jnp.mean(jnp.log(dist + eps))


# ----------------------------------------------------------------------------
# SSLMetaArch.forward_backward (forward / losses only)
# ----------------------------------------------------------------------------
def ssl_meta_arch_forward(params, images, teacher_temp, *, n_local_crops, cfg):
    student_temp = 0.1
    n_global_crops = 2
    global_crops = images["collated_global_crops"]
    local_crops = images["collated_local_crops"]
    masks = images["collated_masks"]
    mask_indices_list = images["mask_indices_list"]
    masks_weight = images["masks_weight"]

    n_local_crops_loss_terms = max(n_local_crops * n_global_crops, 1)
    n_global_crops_loss_terms = (n_global_crops - 1) * n_global_crops
    ibot_loss_scale = 1.0 / n_global_crops
    loss_scales = 2
    denom = n_global_crops_loss_terms + n_local_crops_loss_terms

    embed_dim = params["student_backbone"]["w_embed"].shape[1]
    out_dim = params["student_head"]["wl"].shape[1]

    # ----------------- teacher (no grad) -----------------
    t_cls, t_patch = backbone_fwd(params["teacher_backbone"], global_crops, masks=None)
    n_cls = t_cls.shape[0]
    half = n_cls // n_global_crops
    t_cls_sw = jnp.concatenate([t_cls[half:], t_cls[:half]], axis=0)  # chunk(2) -> cat(c1, c0)

    # do_ibot and not ibot_separate_head: shared DINO head on [cls ; gathered masked patches]
    # NOTE: the zero-padded `upperbound` buffer is skipped: the head runs only on the real masked tokens.
    gathered_t = jnp.take(t_patch.reshape(-1, embed_dim), mask_indices_list, axis=0)
    h_teacher = dino_mlp(params["teacher_head"],
                         jnp.concatenate([t_cls_sw.astype(jnp.bfloat16), gathered_t], axis=0))
    h_t_cls = h_teacher[:n_cls]
    h_t_masked = h_teacher[n_cls:]

    wl_t = params["teacher_head"]["wl"]
    # centering == "centering" (separate centers for DINO cls vs iBOT patches)
    t_cls_logits, teacher_dino_sm = teacher_proto_softmax_center(
        wl_t, h_t_cls, params["dino_center"], teacher_temp)
    t_m_logits, teacher_ibot_sm = teacher_proto_softmax_center(
        wl_t, h_t_masked, params["ibot_center"], teacher_temp)
    teacher_dino_sm_list = teacher_dino_sm.reshape(n_global_crops, -1, out_dim)

    # TODO(synk): dist.all_reduce inside update_center skipped (single device EMA).
    new_dino_center = 0.9 * params["dino_center"] + \
        0.1 * jnp.mean(t_cls_logits.astype(jnp.float32), axis=0, keepdims=True)
    new_ibot_center = 0.9 * params["ibot_center"] + \
        0.1 * jnp.mean(t_m_logits.astype(jnp.float32), axis=0, keepdims=True)

    # ----------------- student -----------------
    s_g_cls, s_g_patch = backbone_fwd(params["student_backbone"], global_crops, masks=masks)
    s_l_cls, _ = backbone_fwd(params["student_backbone"], local_crops, masks=None)

    gathered_s = jnp.take(s_g_patch.reshape(-1, embed_dim), mask_indices_list, axis=0)

    # fmha.BlockDiagonalMask.from_tensor_list == concatenate along the token axis
    cat_inputs = jnp.concatenate(
        [s_l_cls.astype(jnp.bfloat16), s_g_cls.astype(jnp.bfloat16), gathered_s], axis=0)
    h_student = dino_mlp(params["student_head"], cat_inputs)
    n_l, n_g = s_l_cls.shape[0], s_g_cls.shape[0]
    h_local = h_student[:n_l]
    h_global = h_student[n_l:n_l + n_g]
    h_masked = h_student[n_l + n_g:]
    wl_s = params["student_head"]["wl"]

    # ----------------- losses -----------------
    loss_dict = {}
    loss_accumulator = 0.0

    if n_local_crops > 0:
        # one fused proj+CE call per teacher crop over ALL local chunks (teacher rows tiled to match)
        rows_per_chunk = n_l // n_local_crops
        dino_local = 0.0
        for t_idx in range(n_global_crops):
            t_rep = jnp.tile(teacher_dino_sm_list[t_idx], (n_local_crops, 1))
            rows = student_proto_ce(wl_s, h_local, t_rep, student_temp)
            dino_local = dino_local - jnp.sum(rows) / rows_per_chunk   # == sum over chunks of -mean(rows)
        dino_local = dino_local / denom
        loss_dict["dino_local_crops_loss"] = dino_local
        loss_accumulator = loss_accumulator + cfg["dino_loss_weight"] * dino_local

    # DINO global: teacher list already crop-swapped -> row-wise pairing on the flattened tensors
    rows_g = student_proto_ce(wl_s, h_global, teacher_dino_sm, student_temp)
    dino_global = (-jnp.mean(rows_g)) * loss_scales / denom
    loss_dict["dino_global_crops_loss"] = dino_global
    loss_accumulator = loss_accumulator + cfg["dino_loss_weight"] * dino_global

    # KoLeo on pre-head student global cls tokens, per global crop
    kl = cfg["koleo_loss_weight"] * sum(koleo_loss(p) for p in jnp.split(s_g_cls, 2, axis=0))
    loss_accumulator = loss_accumulator + kl
    loss_dict["koleo_loss"] = kl / loss_scales

    # iBOT patch loss
    ib_rows = student_proto_ce(wl_s, h_masked, teacher_ibot_sm, student_temp) * masks_weight
    ibot_patch_loss = (-jnp.sum(ib_rows) / masks.shape[0]) * loss_scales * ibot_loss_scale
    loss_dict["ibot_loss"] = ibot_patch_loss / 2
    loss_accumulator = loss_accumulator + cfg["ibot_loss_weight"] * ibot_patch_loss

    # TODO(synk): backprop_loss / fp16 grad scaler / fsdp_synchronize_streams not applicable (forward only).
    loss_dict["total_loss"] = loss_accumulator
    aux = dict(new_dino_center=new_dino_center, new_ibot_center=new_ibot_center)
    return loss_dict, aux


# ----------------------------------------------------------------------------
# Main
# ----------------------------------------------------------------------------
if __name__ == "__main__":
    key = jax.random.PRNGKey(0)
    keys = jax.random.split(key, 8)

    # small synthetic config (dims lane-full; bottleneck a multiple of 256 for v6e/v7x MXU;
    # out_dim = 2 * PROTO_TILE so the K-tiled online-softmax / online-CE path is exercised)
    B = 4                 # images per crop
    n_global, n_local = 2, 2
    C, Hg, Hl, ps = 3, 32, 16, 8
    embed_dim = 128
    hidden_dim, bottleneck_dim, out_dim = 256, 256, 512
    P = (Hg // ps) ** 2   # patches per global crop image = 16
    masked_per_img = 2
    M = n_global * B * masked_per_img   # n_masked_patches = 16
    upperbound = 24
    teacher_temp = 0.07
    cfg = dict(dino_loss_weight=1.0, koleo_loss_weight=0.1, ibot_loss_weight=1.0)

    global_crops = jax.random.normal(keys[0], (n_global * B, C, Hg, Hg), jnp.float32)
    local_crops = jax.random.normal(keys[1], (n_local * B, C, Hl, Hl), jnp.float32)

    # deterministic iBOT masks: 2 masked patches per global-crop image
    masks_np = []
    mask_idx = []
    for i in range(n_global * B):
        p0, p1 = (2 * i) % P, (2 * i + 7) % P
        row = [False] * P
        row[p0] = True
        row[p1] = True
        masks_np.append(row)
        for pidx in sorted((p0, p1)):
            mask_idx.append(i * P + pidx)
    masks = jnp.array(masks_np, dtype=bool)                       # (8, 16)
    mask_indices_list = jnp.array(mask_idx, dtype=jnp.int32)      # (16,)
    masks_weight = jnp.full((M,), 1.0 / masked_per_img, jnp.float32)

    images = dict(
        collated_global_crops=global_crops,
        collated_local_crops=local_crops,
        collated_masks=masks,
        mask_indices_list=mask_indices_list,
        n_masked_patches=jnp.array([M], jnp.int32),
        upperbound=upperbound,
        masks_weight=masks_weight,
    )

    params = dict(
        student_backbone=init_backbone(keys[2], C * ps * ps, embed_dim),
        teacher_backbone=init_backbone(keys[3], C * ps * ps, embed_dim),
        student_head=init_dino_head(keys[4], embed_dim, hidden_dim, bottleneck_dim, out_dim),
        teacher_head=init_dino_head(keys[5], embed_dim, hidden_dim, bottleneck_dim, out_dim),
        dino_center=jnp.zeros((1, out_dim), jnp.float32),
        ibot_center=jnp.zeros((1, out_dim), jnp.float32),
    )

    loss_dict, aux = ssl_meta_arch_forward(
        params, images, teacher_temp, n_local_crops=n_local, cfg=cfg
    )
    total = jax.block_until_ready(loss_dict["total_loss"])
    jax.block_until_ready(aux["new_dino_center"])
    jax.block_until_ready(aux["new_ibot_center"])
    assert bool(jnp.isfinite(total)), "non-finite total loss"
    print("KERNEL_OK")
</pallas_src>

<mosaic_0001>
module attributes {stable_mosaic.version = 11 : i64} {
  func.func @patch_embed_ln_kernel(%arg0: i32, %arg1: memref<128x192xbf16, #tpu.memory_space<vmem>>, %arg2: memref<128x1xf32, #tpu.memory_space<vmem>>, %arg3: memref<192x128xbf16, #tpu.memory_space<vmem>>, %arg4: memref<1x128xf32, #tpu.memory_space<vmem>>, %arg5: memref<1x128xf32, #tpu.memory_space<vmem>>, %arg6: memref<1x128xf32, #tpu.memory_space<vmem>>, %arg7: memref<1x128xf32, #tpu.memory_space<vmem>>, %arg8: memref<1x128xf32, #tpu.memory_space<vmem>>, %arg9: memref<128x128xbf16, #tpu.memory_space<vmem>>, %arg10: memref<8x128xf32, #tpu.memory_space<vmem>>) attributes {dimension_semantics = [#tpu.dimension_semantics<parallel>], iteration_bounds = array<i64: 1>, scalar_prefetch = 0 : i64, scratch_operands = 0 : i64, tpu.core_type = #tpu.core_type<tc>, window_params = [{transform_indices = @transform_0, window_bounds = array<i64: 128, 192>}, {transform_indices = @transform_1, window_bounds = array<i64: 128, 1>}, {pipeline_mode = #tpu.pipeline_mode<synchronous>, transform_indices = @transform_2, window_bounds = array<i64: 192, 128>}, {pipeline_mode = #tpu.pipeline_mode<synchronous>, transform_indices = @transform_3, window_bounds = array<i64: 1, 128>}, {pipeline_mode = #tpu.pipeline_mode<synchronous>, transform_indices = @transform_4, window_bounds = array<i64: 1, 128>}, {pipeline_mode = #tpu.pipeline_mode<synchronous>, transform_indices = @transform_5, window_bounds = array<i64: 1, 128>}, {pipeline_mode = #tpu.pipeline_mode<synchronous>, transform_indices = @transform_6, window_bounds = array<i64: 1, 128>}, {pipeline_mode = #tpu.pipeline_mode<synchronous>, transform_indices = @transform_7, window_bounds = array<i64: 1, 128>}, {transform_indices = @transform_8, window_bounds = array<i64: 128, 128>}, {transform_indices = @transform_9, window_bounds = array<i64: 8, 128>}]} {
    %c0 = arith.constant 0 : index
    %c0_0 = arith.constant 0 : index
    %0 = vector.load %arg1[%c0, %c0_0] : memref<128x192xbf16, #tpu.memory_space<vmem>>, vector<128x192xbf16>
    %c0_1 = arith.constant 0 : index
    %c0_2 = arith.constant 0 : index
    %1 = vector.load %arg3[%c0_1, %c0_2] : memref<192x128xbf16, #tpu.memory_space<vmem>>, vector<192x128xbf16>
    %cst = arith.constant dense<0.000000e+00> : vector<128x128xf32>
    %2 = tpu.matmul %0, %1, %cst {dimension_numbers = #tpu.dot_dimension_numbers<[1], [0], [0], [1], [0, 0, 1, 1], [], []>} : vector<128x192xbf16>, vector<192x128xbf16>, vector<128x128xf32> -> vector<128x128xf32>
    %c0_3 = arith.constant 0 : index
    %c0_4 = arith.constant 0 : index
    %3 = vector.load %arg4[%c0_3, %c0_4] : memref<1x128xf32, #tpu.memory_space<vmem>>, vector<1x128xf32>
    %4 = vector.broadcast %3 : vector<1x128xf32> to vector<128x128xf32>
    %5 = arith.addf %2, %4 : vector<128x128xf32>
    %c0_5 = arith.constant 0 : index
    %c0_6 = arith.constant 0 : index
    %6 = vector.load %arg2[%c0_5, %c0_6] : memref<128x1xf32, #tpu.memory_space<vmem>>, vector<128x1xf32>
    %cst_7 = arith.constant 1.000000e+00 : f32
    %7 = vector.broadcast %cst_7 : f32 to vector<128x1xf32>
    %8 = arith.subf %7, %6 : vector<128x1xf32>
    %9 = vector.broadcast %8 : vector<128x1xf32> to vector<128x128xf32>
    %10 = arith.mulf %5, %9 : vector<128x128xf32>
    %c0_8 = arith.constant 0 : index
    %c0_9 = arith.constant 0 : index
    %11 = vector.load %arg5[%c0_8, %c0_9] : memref<1x128xf32, #tpu.memory_space<vmem>>, vector<1x128xf32>
    %12 = vector.broadcast %11 : vector<1x128xf32> to vector<128x128xf32>
    %13 = vector.broadcast %6 : vector<128x1xf32> to vector<128x128xf32>
    %14 = arith.mulf %12, %13 : vector<128x128xf32>
    %15 = arith.addf %10, %14 : vector<128x128xf32>
    %16 = vector.extract_strided_slice %15 {offsets = [0, 0], sizes = [16, 128], strides = [1, 1]} : vector<128x128xf32> to vector<16x128xf32>
    %cst_10 = arith.constant dense<0.000000e+00> : vector<128xf32>
    %17 = vector.multi_reduction <add>, %16, %cst_10 [0] : vector<16x128xf32> to vector<128xf32>
    %18 = vector.shape_cast %17 : vector<128xf32> to vector<1x128xf32>
    %cst_11 = arith.constant 6.250000e-02 : f32
    %19 = vector.broadcast %cst_11 : f32 to vector<1x128xf32>
    %20 = arith.mulf %18, %19 : vector<1x128xf32>
    %21 = vector.extract_strided_slice %15 {offsets = [16, 0], sizes = [16, 128], strides = [1, 1]} : vector<128x128xf32> to vector<16x128xf32>
    %cst_12 = arith.constant dense<0.000000e+00> : vector<128xf32>
    %22 = vector.multi_reduction <add>, %21, %cst_12 [0] : vector<16x128xf32> to vector<128xf32>
    %23 = vector.shape_cast %22 : vector<128xf32> to vector<1x128xf32>
    %cst_13 = arith.constant 6.250000e-02 : f32
    %24 = vector.broadcast %cst_13 : f32 to vector<1x128xf32>
    %25 = arith.mulf %23, %24 : vector<1x128xf32>
    %26 = vector.extract_strided_slice %15 {offsets = [32, 0], sizes = [16, 128], strides = [1, 1]} : vector<128x128xf32> to vector<16x128xf32>
    %cst_14 = arith.constant dense<0.000000e+00> : vector<128xf32>
    %27 = vector.multi_reduction <add>, %26, %cst_14 [0] : vector<16x128xf32> to vector<128xf32>
    %28 = vector.shape_cast %27 : vector<128xf32> to vector<1x128xf32>
    %cst_15 = arith.constant 6.250000e-02 : f32
    %29 = vector.broadcast %cst_15 : f32 to vector<1x128xf32>
    %30 = arith.mulf %28, %29 : vector<1x128xf32>
    %31 = vector.extract_strided_slice %15 {offsets = [48, 0], sizes = [16, 128], strides = [1, 1]} : vector<128x128xf32> to vector<16x128xf32>
    %cst_16 = arith.constant dense<0.000000e+00> : vector<128xf32>
    %32 = vector.multi_reduction <add>, %31, %cst_16 [0] : vector<16x128xf32> to vector<128xf32>
    %33 = vector.shape_cast %32 : vector<128xf32> to vector<1x128xf32>
    %cst_17 = arith.constant 6.250000e-02 : f32
    %34 = vector.broadcast %cst_17 : f32 to vector<1x128xf32>
    %35 = arith.mulf %33, %34 : vector<1x128xf32>
    %36 = vector.extract_strided_slice %15 {offsets = [64, 0], sizes = [16, 128], strides = [1, 1]} : vector<128x128xf32> to vector<16x128xf32>
    %cst_18 = arith.constant dense<0.000000e+00> : vector<128xf32>
    %37 = vector.multi_reduction <add>, %36, %cst_18 [0] : vector<16x128xf32> to vector<128xf32>
    %38 = vector.shape_cast %37 : vector<128xf32> to vector<1x128xf32>
    %cst_19 = arith.constant 6.250000e-02 : f32
    %39 = vector.broadcast %cst_19 : f32 to vector<1x128xf32>
    %40 = arith.mulf %38, %39 : vector<1x128xf32>
    %41 = vector.extract_strided_slice %15 {offsets = [80, 0], sizes = [16, 128], strides = [1, 1]} : vector<128x128xf32> to vector<16x128xf32>
    %cst_20 = arith.constant dense<0.000000e+00> : vector<128xf32>
    %42 = vector.multi_reduction <add>, %41, %cst_20 [0] : vector<16x128xf32> to vector<128xf32>
    %43 = vector.shape_cast %42 : vector<128xf32> to vector<1x128xf32>
    %cst_21 = arith.constant 6.250000e-02 : f32
    %44 = vector.broadcast %cst_21 : f32 to vector<1x128xf32>
    %45 = arith.mulf %43, %44 : vector<1x128xf32>
    %46 = vector.extract_strided_slice %15 {offsets = [96, 0], sizes = [16, 128], strides = [1, 1]} : vector<128x128xf32> to vector<16x128xf32>
    %cst_22 = arith.constant dense<0.000000e+00> : vector<128xf32>
    %47 = vector.multi_reduction <add>, %46, %cst_22 [0] : vector<16x128xf32> to vector<128xf32>
    %48 = vector.shape_cast %47 : vector<128xf32> to vector<1x128xf32>
    %cst_23 = arith.constant 6.250000e-02 : f32
    %49 = vector.broadcast %cst_23 : f32 to vector<1x128xf32>
    %50 = arith.mulf %48, %49 : vector<1x128xf32>
    %51 = vector.extract_strided_slice %15 {offsets = [112, 0], sizes = [16, 128], strides = [1, 1]} : vector<128x128xf32> to vector<16x128xf32>
    %cst_24 = arith.constant dense<0.000000e+00> : vector<128xf32>
    %52 = vector.multi_reduction <add>, %51, %cst_24 [0] : vector<16x128xf32> to vector<128xf32>
    %53 = vector.shape_cast %52 : vector<128xf32> to vector<1x128xf32>
    %cst_25 = arith.constant 6.250000e-02 : f32
    %54 = vector.broadcast %cst_25 : f32 to vector<1x128xf32>
    %55 = arith.mulf %53, %54 : vector<1x128xf32>
    %c0_26 = arith.constant 0 : index
    %c0_27 = arith.constant 0 : index
    %56 = vector.load %arg6[%c0_26, %c0_27] : memref<1x128xf32, #tpu.memory_space<vmem>>, vector<1x128xf32>
    %57 = tpu.concatenate %20, %25, %30, %35, %40, %45, %50, %55 in 0 : vector<1x128xf32>, vector<1x128xf32>, vector<1x128xf32>, vector<1x128xf32>, vector<1x128xf32>, vector<1x128xf32>, vector<1x128xf32>, vector<1x128xf32> -> vector<8x128xf32>
    %58 = vector.broadcast %56 : vector<1x128xf32> to vector<8x128xf32>
    %59 = arith.addf %58, %57 : vector<8x128xf32>
    %cst_28 = arith.constant dense<0.000000e+00> : vector<8xf32>
    %60 = vector.multi_reduction <add>, %59, %cst_28 [1] : vector<8x128xf32> to vector<8xf32>
    %61 = vector.shape_cast %60 : vector<8xf32> to vector<8x1xf32>
    %cst_29 = arith.constant 1.280000e+02 : f32
    %62 = vector.broadcast %cst_29 : f32 to vector<8x1xf32>
    %63 = arith.divf %61, %62 : vector<8x1xf32>
    %64 = vector.broadcast %63 : vector<8x1xf32> to vector<8x128xf32>
    %65 = arith.subf %59, %64 : vector<8x128xf32>
    %66 = arith.mulf %65, %65 : vector<8x128xf32>
    %cst_30 = arith.constant dense<0.000000e+00> : vector<8xf32>
    %67 = vector.multi_reduction <add>, %66, %cst_30 [1] : vector<8x128xf32> to vector<8xf32>
    %68 = vector.shape_cast %67 : vector<8xf32> to vector<8x1xf32>
    %cst_31 = arith.constant 1.280000e+02 : f32
    %69 = vector.broadcast %cst_31 : f32 to vector<8x1xf32>
    %70 = arith.divf %68, %69 : vector<8x1xf32>
    %71 = vector.broadcast %63 : vector<8x1xf32> to vector<8x128xf32>
    %72 = arith.subf %59, %71 : vector<8x128xf32>
    %cst_32 = arith.constant 9.99999997E-7 : f32
    %73 = vector.broadcast %cst_32 : f32 to vector<8x1xf32>
    %74 = arith.addf %70, %73 : vector<8x1xf32>
    %75 = math.rsqrt %74 : vector<8x1xf32>
    %76 = vector.broadcast %75 : vector<8x1xf32> to vector<8x128xf32>
    %77 = arith.mulf %72, %76 : vector<8x128xf32>
    %c0_33 = arith.constant 0 : index
    %c0_34 = arith.constant 0 : index
    %78 = vector.load %arg7[%c0_33, %c0_34] : memref<1x128xf32, #tpu.memory_space<vmem>>, vector<1x128xf32>
    %79 = vector.broadcast %78 : vector<1x128xf32> to vector<8x128xf32>
    %80 = arith.mulf %77, %79 : vector<8x128xf32>
    %c0_35 = arith.constant 0 : index
    %c0_36 = arith.constant 0 : index
    %81 = vector.load %arg8[%c0_35, %c0_36] : memref<1x128xf32, #tpu.memory_space<vmem>>, vector<1x128xf32>
    %82 = vector.broadcast %81 : vector<1x128xf32> to vector<8x128xf32>
    %83 = arith.addf %80, %82 : vector<8x128xf32>
    %c0_37 = arith.constant 0 : index
    %c0_38 = arith.constant 0 : index
    %84 = vector.load %arg10[%c0_37, %c0_38] : memref<8x128xf32, #tpu.memory_space<vmem>>, vector<8x128xf32>
    tpu.vector_store %arg10[%c0_37, %c0_38], %83 {strides = array<i32>} : memref<8x128xf32, #tpu.memory_space<vmem>>, vector<8x128xf32>,
    %cst_39 = arith.constant dense<0.000000e+00> : vector<128xf32>
    %85 = vector.multi_reduction <add>, %15, %cst_39 [1] : vector<128x128xf32> to vector<128xf32>
    %86 = vector.shape_cast %85 : vector<128xf32> to vector<128x1xf32>
    %cst_40 = arith.constant 1.280000e+02 : f32
    %87 = vector.broadcast %cst_40 : f32 to vector<128x1xf32>
    %88 = arith.divf %86, %87 : vector<128x1xf32>
    %89 = vector.broadcast %88 : vector<128x1xf32> to vector<128x128xf32>
    %90 = arith.subf %15, %89 : vector<128x128xf32>
    %91 = arith.mulf %90, %90 : vector<128x128xf32>
    %cst_41 = arith.constant dense<0.000000e+00> : vector<128xf32>
    %92 = vector.multi_reduction <add>, %91, %cst_41 [1] : vector<128x128xf32> to vector<128xf32>
    %93 = vector.shape_cast %92 : vector<128xf32> to vector<128x1xf32>
    %cst_42 = arith.constant 1.280000e+02 : f32
    %94 = vector.broadcast %cst_42 : f32 to vector<128x1xf32>
    %95 = arith.divf %93, %94 : vector<128x1xf32>
    %96 = vector.broadcast %88 : vector<128x1xf32> to vector<128x128xf32>
    %97 = arith.subf %15, %96 : vector<128x128xf32>
    %cst_43 = arith.constant 9.99999997E-7 : f32
    %98 = vector.broadcast %cst_43 : f32 to vector<128x1xf32>
    %99 = arith.addf %95, %98 : vector<128x1xf32>
    %100 = math.rsqrt %99 : vector<128x1xf32>
    %101 = vector.broadcast %100 : vector<128x1xf32> to vector<128x128xf32>
    %102 = arith.mulf %97, %101 : vector<128x128xf32>
    %c0_44 = arith.constant 0 : index
    %c0_45 = arith.constant 0 : index
    %103 = vector.load %arg7[%c0_44, %c0_45] : memref<1x128xf32, #tpu.memory_space<vmem>>, vector<1x128xf32>
    %104 = vector.broadcast %103 : vector<1x128xf32> to vector<128x128xf32>
    %105 = arith.mulf %102, %104 : vector<128x128xf32>
    %c0_46 = arith.constant 0 : index
    %c0_47 = arith.constant 0 : index
    %106 = vector.load %arg8[%c0_46, %c0_47] : memref<1x128xf32, #tpu.memory_space<vmem>>, vector<1x128xf32>
    %107 = vector.broadcast %106 : vector<1x128xf32> to vector<128x128xf32>
    %108 = arith.addf %105, %107 : vector<128x128xf32>
    %109 = arith.truncf %108 : vector<128x128xf32> to vector<128x128xbf16>
    %c0_48 = arith.constant 0 : index
    %c0_49 = arith.constant 0 : index
    %110 = vector.load %arg9[%c0_48, %c0_49] : memref<128x128xbf16, #tpu.memory_space<vmem>>, vector<128x128xbf16>
    tpu.vector_store %arg9[%c0_48, %c0_49], %109 {strides = array<i32>} : memref<128x128xbf16, #tpu.memory_space<vmem>>, vector<128x128xbf16>,
    return
  }
  func.func @transform_0(%arg0: i32) -> (i32, i32) {
    %c0_i32 = arith.constant 0 : i32
    %c0_i32_0 = arith.constant 0 : i32
    return %arg0, %c0_i32 : i32, i32
  }
  func.func @transform_1(%arg0: i32) -> (i32, i32) {
    %c0_i32 = arith.constant 0 : i32
    %c0_i32_0 = arith.constant 0 : i32
    return %arg0, %c0_i32 : i32, i32
  }
  func.func @transform_2(%arg0: i32) -> (i32, i32) {
    %c0_i32 = arith.constant 0 : i32
    %c0_i32_0 = arith.constant 0 : i32
    %c0_i32_1 = arith.constant 0 : i32
    return %c0_i32, %c0_i32_0 : i32, i32
  }
  func.func @transform_3(%arg0: i32) -> (i32, i32) {
    %c0_i32 = arith.constant 0 : i32
    %c0_i32_0 = arith.constant 0 : i32
    %c0_i32_1 = arith.constant 0 : i32
    return %c0_i32, %c0_i32_0 : i32, i32
  }
  func.func @transform_4(%arg0: i32) -> (i32, i32) {
    %c0_i32 = arith.constant 0 : i32
    %c0_i32_0 = arith.constant 0 : i32
    %c0_i32_1 = arith.constant 0 : i32
    return %c0_i32, %c0_i32_0 : i32, i32
  }
  func.func @transform_5(%arg0: i32) -> (i32, i32) {
    %c0_i32 = arith.constant 0 : i32
    %c0_i32_0 = arith.constant 0 : i32
    %c0_i32_1 = arith.constant 0 : i32
    return %c0_i32, %c0_i32_0 : i32, i32
  }
  func.func @transform_6(%arg0: i32) -> (i32, i32) {
    %c0_i32 = arith.constant 0 : i32
    %c0_i32_0 = arith.constant 0 : i32
    %c0_i32_1 = arith.constant 0 : i32
    return %c0_i32, %c0_i32_0 : i32, i32
  }
  func.func @transform_7(%arg0: i32) -> (i32, i32) {
    %c0_i32 = arith.constant 0 : i32
    %c0_i32_0 = arith.constant 0 : i32
    %c0_i32_1 = arith.constant 0 : i32
    return %c0_i32, %c0_i32_0 : i32, i32
  }
  func.func @transform_8(%arg0: i32) -> (i32, i32) {
    %c0_i32 = arith.constant 0 : i32
    %c0_i32_0 = arith.constant 0 : i32
    return %arg0, %c0_i32 : i32, i32
  }
  func.func @transform_9(%arg0: i32) -> (i32, i32) {
    %c0_i32 = arith.constant 0 : i32
    %c0_i32_0 = arith.constant 0 : i32
    return %arg0, %c0_i32 : i32, i32
  }
}

</mosaic_0001>

<bundles_post_ra>
// kernel: tpu_custom_call.1
= control target key start
LH: loop header
LB: loop body
LE: loop exit
PB: predicated region body
PF: predicated region fallthrough
CT: control target
= control target key end

     0   :  { %15 = vsyncpa [#allocation3], 0  ;;  %v1312_v1 = vmov 0   ;;  %vm225_vm0 = vcmask 523264   ;;  %s1857_s0 = inlined_call_operand.vmem [shape: bf16[128,192], index: 0, kind: input, shape index: {}]   ;;  %s1858_s1 = inlined_call_operand.vmem [shape: f32[128,1], index: 1, kind: input, shape index: {}]   ;;  %s1859_s2 = inlined_call_operand.vmem [shape: bf16[192,128], index: 2, kind: input, shape index: {}]   ;;  %s1860_s3 = inlined_call_operand.vmem [shape: f32[1,128], index: 3, kind: input, shape index: {}]   ;;  %s1861_s4 = inlined_call_operand.vmem [shape: f32[1,128], index: 4, kind: input, shape index: {}]   ;;  %s1862_s5 = inlined_call_operand.vmem [shape: f32[1,128], index: 5, kind: input, shape index: {}]   ;;  %s1863_s6 = inlined_call_operand.vmem [shape: f32[1,128], index: 6, kind: input, shape index: {}]   ;;  %s1864_s7 = inlined_call_operand.vmem [shape: f32[1,128], index: 7, kind: input, shape index: {}]   ;;  %s1865_s8 = inlined_call_operand.hbm [shape: bf16[128,128], index: 8, kind: output, shape index: {0}]   ;;  %s1866_s9 = inlined_call_operand.hbm [shape: f32[8,128], index: 9, kind: output, shape index: {1}]  }
   0x1   :  { %v1194_v0 = vld [vmem:[%s1859_s2] sm:$0xff]   ;;  %250 = vmatprep.subr.bf16.mxu0 %v1312_v1  ;;  %1163 = vmatprep.subr.bf16.mxu1 %v1312_v1  ;;  %v1195_v2 = vld [vmem:[%s1859_s2 + $0x8] sm:$0xff]   ;;  %v1196_v3 = vld [vmem:[%s1859_s2 + $0x10] sm:$0xff]  }
   0x2   :  { %251 = vmatpush1.bf16.msra.mxu0 %v1194_v0  ;;  %1175 = vmatpush1.bf16.msra.mxu1 %v1194_v0  ;;  %v1197_v4 = vld [vmem:[%s1859_s2 + $0x18] sm:$0xff]   ;;  %v349_v5 = vld [vmem:[%s1858_s1 + $0x10] sm:$0xff]  ;;  %v347_v6 = vld [vmem:[%s1858_s1] sm:$0xff] }
   0x3   :  { %252 = vmatprep.subr.bf16.mxu0 %v1312_v1  ;;  %1164 = vmatprep.subr.bf16.mxu1 %v1312_v1  ;;  %v365_v7 = vsub.f32 1.0, %v349_v5  ;;  %v363_v8 = vsub.f32 1.0, %v347_v6  ;;  %v1208_v9 = vld [vmem:[%s1857_s0 + $0x4] ss:$8 sps:$4 sm:$0xff]   ;;  %v350_v12 = vld [vmem:[%s1858_s1 + $0x18] sm:$0xff]  ;;  %v1200_v17 = vld [vmem:[%s1859_s2 + $0x30] sm:$0xff]  }
   0x4   :  { %1193 = vset.pattern.permute.xlu1 %v1312_v1  ;;  %1192 = vset.pattern.permute.xlu0 %v1312_v1  ;;  %v1198_v10 = vld [vmem:[%s1859_s2 + $0x20] sm:$0xff]   ;;  %v348_v13 = vld [vmem:[%s1858_s1 + $0x8] sm:$0xff]  ;;  %v366_v14 = vsub.f32 1.0, %v350_v12  ;;  %v1201_v20 = vld [vmem:[%s1859_s2 + $0x38] sm:$0xff]  }
   0x5   :  { %v1211_v11 = vld [vmem:[%s1857_s0 + $0x44] ss:$8 sps:$4 sm:$0xff]   ;;  %391 = vperm.xlu1 %1193, %v365_v7   ;;  %381 = vperm.xlu0 %1192, %v363_v8   ;;  %v364_v15 = vsub.f32 1.0, %v348_v13 }
   0x6   :  { %253 = vmatpush1.bf16.msra.mxu0 %v1195_v2  ;;  %1176 = vmatpush1.bf16.msra.mxu1 %v1195_v2  ;;  %v1199_v16 = vld [vmem:[%s1859_s2 + $0x28] sm:$0xff]   ;;  %v351_v19 = vld [vmem:[%s1858_s1 + $0x20] sm:$0xff] }
   0x7   :  { %254 = vmatprep.subr.bf16.mxu0 %v1312_v1  ;;  %1165 = vmatprep.subr.bf16.mxu1 %v1312_v1  ;;  %v352_v18 = vld [vmem:[%s1858_s1 + $0x28] sm:$0xff]  ;;  %v367_v22 = vsub.f32 1.0, %v351_v19 }
   0x8   :  { %1070 = vmatprep.mubr.msk.bf16.mxu0 %vm225_vm0, %v1208_v9  ;;  %1074 = vmatprep.mubr.msk.bf16.mxu1 %vm225_vm0, %v1211_v11  ;;  %v368_v21 = vsub.f32 1.0, %v352_v18 }
   0x9   :  { %396 = vperm.xlu1 %1193, %v366_v14   ;;  %386 = vperm.xlu0 %1192, %v364_v15  }
   0xa   :  { %255 = vmatpush1.bf16.msra.mxu0 %v1196_v3  ;;  %1177 = vmatpush1.bf16.msra.mxu1 %v1196_v3 }
   0xb   :  { %256 = vmatprep.subr.bf16.mxu0 %v1312_v1  ;;  %1166 = vmatprep.subr.bf16.mxu1 %v1312_v1 }
   0xd   :  { %489 = vperm.xlu1 %1193, %v348_v13   ;;  %484 = vperm.xlu0 %1192, %v347_v6  }
   0xe   :  { %257 = vmatpush1.bf16.msra.mxu0 %v1197_v4  ;;  %1178 = vmatpush1.bf16.msra.mxu1 %v1197_v4 }
   0xf   :  { %258 = vmatprep.subr.bf16.mxu0 %v1312_v1  ;;  %1167 = vmatprep.subr.bf16.mxu1 %v1312_v1 }
  0x11   :  { %499 = vperm.xlu1 %1193, %v350_v12   ;;  %494 = vperm.xlu0 %1192, %v349_v5  }
  0x12   :  { %259 = vmatpush1.bf16.msra.mxu0 %v1198_v10  ;;  %1179 = vmatpush1.bf16.msra.mxu1 %v1198_v10 }
  0x13   :  { %260 = vmatprep.subr.bf16.mxu0 %v1312_v1  ;;  %1168 = vmatprep.subr.bf16.mxu1 %v1312_v1 }
  0x16   :  { %261 = vmatpush1.bf16.msra.mxu0 %v1199_v16  ;;  %1180 = vmatpush1.bf16.msra.mxu1 %v1199_v16 }
  0x17   :  { %262 = vmatprep.subr.bf16.mxu0 %v1312_v1  ;;  %1169 = vmatprep.subr.bf16.mxu1 %v1312_v1 }
  0x1a   :  { %263 = vmatpush1.bf16.msra.mxu0 %v1200_v17  ;;  %1181 = vmatpush1.bf16.msra.mxu1 %v1200_v17 }
  0x1b   :  { %264 = vmatprep.subr.bf16.mxu0 %v1312_v1  ;;  %1170 = vmatprep.subr.bf16.mxu1 %v1312_v1 }
  0x1c   :  { %16 = vsyncpa [#allocation5], 0  ;;  %v1202_v23 = vld [vmem:[%s1859_s2 + $0x40] sm:$0xff]   ;;  %406 = vperm.xlu1 %1193, %v368_v21   ;;  %401 = vperm.xlu0 %1192, %v367_v22   ;;  %v354_v24 = vld [vmem:[%s1858_s1 + $0x38] sm:$0xff]  ;;  %vm659_vm1 = vcmask 1040384   ;;  %vm661_vm2 = vcmask 1041408  }
  0x1d   :  { %v353_v25 = vld [vmem:[%s1858_s1 + $0x30] sm:$0xff]  ;;  %v1203_v26 = vld [vmem:[%s1859_s2 + $0x48] sm:$0xff]   ;;  %v370_v27 = vsub.f32 1.0, %v354_v24  ;;  %v355_v31 = vld [vmem:[%s1858_s1 + $0x40] sm:$0xff]  ;;  %vm663_vm3 = vcmask 1042432   ;;  %vm665_vm4 = vcmask 1043456  }
  0x1e   :  { %265 = vmatpush1.bf16.msra.mxu0 %v1201_v20  ;;  %1182 = vmatpush1.bf16.msra.mxu1 %v1201_v20  ;;  %v369_v28 = vsub.f32 1.0, %v353_v25  ;;  %v1204_v29 = vld [vmem:[%s1859_s2 + $0x50] sm:$0xff]   ;;  %v356_v30 = vld [vmem:[%s1858_s1 + $0x48] sm:$0xff]  ;;  %v1205_v32 = vld [vmem:[%s1859_s2 + $0x58] sm:$0xff]   ;;  %v371_v34 = vsub.f32 1.0, %v355_v31  ;;  %vm667_vm5 = vcmask 1044480  }
  0x1f   :  { %266 = vmatprep.subr.bf16.mxu0 %v1312_v1  ;;  %1171 = vmatprep.subr.bf16.mxu1 %v1312_v1  ;;  %v372_v33 = vsub.f32 1.0, %v356_v30  ;;  %v1206_v35 = vld [vmem:[%s1857_s0] ss:$8 sps:$4 sm:$0xff]   ;;  %v1212_v37 = vld [vmem:[%s1857_s0 + $0x14] ss:$8 sps:$4 sm:$0xff]   ;;  %vm669_vm6 = vcmask 1045504  }
  0x20   :  { %509 = vperm.xlu1 %1193, %v352_v18   ;;  %504 = vperm.xlu0 %1192, %v351_v19   ;;  %v1209_v36 = vld [vmem:[%s1857_s0 + $0x40] ss:$8 sps:$4 sm:$0xff]   ;;  %v1214_v38 = vld [vmem:[%s1857_s0 + $0x54] ss:$8 sps:$4 sm:$0xff]   ;;  %v1216_v43 = vld [vmem:[%s1857_s0 + $0x10] ss:$8 sps:$4 sm:$0xff]  }
  0x21   :  { %v358_v39 = vld [vmem:[%s1858_s1 + $0x58] sm:$0xff]  ;;  %v357_v40 = vld [vmem:[%s1858_s1 + $0x50] sm:$0xff]  ;;  %v1218_v45 = vld [vmem:[%s1857_s0 + $0x24] ss:$8 sps:$4 sm:$0xff]   ;;  %vm671_vm7 = vcmask 1046528  }
  0x22   :  { %267 = vmatpush1.bf16.msra.mxu0 %v1202_v23  ;;  %1183 = vmatpush1.bf16.msra.mxu1 %v1202_v23  ;;  %v374_v41 = vsub.f32 1.0, %v358_v39  ;;  %v373_v42 = vsub.f32 1.0, %v357_v40  ;;  %v1217_v44 = vld [vmem:[%s1857_s0 + $0x50] ss:$8 sps:$4 sm:$0xff]   ;;  %v1220_v46 = vld [vmem:[%s1857_s0 + $0x64] ss:$8 sps:$4 sm:$0xff]  }
  0x23   :  { %268 = vmatprep.subr.bf16.mxu0 %v1312_v1  ;;  %1172 = vmatprep.subr.bf16.mxu1 %v1312_v1  ;;  %v360_v47 = vld [vmem:[%s1858_s1 + $0x68] sm:$0xff]  ;;  %v359_v48 = vld [vmem:[%s1858_s1 + $0x60] sm:$0xff]  ;;  %v1224_v53 = vld [vmem:[%s1857_s0 + $0x34] ss:$8 sps:$4 sm:$0xff]  }
  0x24   :  { %416 = vperm.xlu1 %1193, %v370_v27   ;;  %411 = vperm.xlu0 %1192, %v369_v28   ;;  %v376_v49 = vsub.f32 1.0, %v360_v47  ;;  %v375_v50 = vsub.f32 1.0, %v359_v48  ;;  %v1222_v51 = vld [vmem:[%s1857_s0 + $0x20] ss:$8 sps:$4 sm:$0xff]   ;;  %v1226_v54 = vld [vmem:[%s1857_s0 + $0x74] ss:$8 sps:$4 sm:$0xff]  }
  0x25   :  { %v1223_v52 = vld [vmem:[%s1857_s0 + $0x60] ss:$8 sps:$4 sm:$0xff]   ;;  %v362_v55 = vld [vmem:[%s1858_s1 + $0x78] sm:$0xff]  ;;  %v361_v56 = vld [vmem:[%s1858_s1 + $0x70] sm:$0xff] }
  0x26   :  { %269 = vmatpush1.bf16.msra.mxu0 %v1203_v26  ;;  %1184 = vmatpush1.bf16.msra.mxu1 %v1203_v26  ;;  %v378_v57 = vsub.f32 1.0, %v362_v55  ;;  %v377_v58 = vsub.f32 1.0, %v361_v56  ;;  %v1228_v59 = vld [vmem:[%s1857_s0 + $0x30] ss:$8 sps:$4 sm:$0xff]   ;;  %v1558_v21 = vld [vmem:[%s1860_s3] ss:$0 sm:$0xff] }
  0x27   :  { %270 = vmatprep.subr.bf16.mxu0 %v1312_v1  ;;  %1173 = vmatprep.subr.bf16.mxu1 %v1312_v1  ;;  %v1229_v60 = vld [vmem:[%s1857_s0 + $0x70] ss:$8 sps:$4 sm:$0xff]   ;;  %v1563_v22 = vld [vmem:[%s1861_s4] ss:$0 sm:$0xff] }
  0x28   :  { %519 = vperm.xlu1 %1193, %v354_v24   ;;  %514 = vperm.xlu0 %1192, %v353_v25  }
  0x2a   :  { %271 = vmatpush1.bf16.msra.mxu0 %v1204_v29  ;;  %1185 = vmatpush1.bf16.msra.mxu1 %v1204_v29 }
  0x2b   :  { %272 = vmatprep.subr.bf16.mxu0 %v1312_v1  ;;  %1174 = vmatprep.subr.bf16.mxu1 %v1312_v1 }
  0x2c   :  { %426 = vperm.xlu1 %1193, %v372_v33   ;;  %421 = vperm.xlu0 %1192, %v371_v34  }
  0x2e   :  { %273 = vmatpush1.bf16.msra.mxu0 %v1205_v32  ;;  %1186 = vmatpush1.bf16.msra.mxu1 %v1205_v32 }
  0x30   :  { %529 = vperm.xlu1 %1193, %v356_v30   ;;  %524 = vperm.xlu0 %1192, %v355_v31  }
  0x31   :  { %283 = vmatmul.mubr.bf16.vlgmr.msra.gmra.mrb[0].mxu0 %v1206_v35  ;;  %315 = vmatmul.mubr.bf16.vlgmr.msra.gmra.mrb[0].mxu1 %v1209_v36 }
  0x32   :  { %1071 = vmatprep.mubr.msk.bf16.mxu0 %vm225_vm0, %v1212_v37  ;;  %1075 = vmatprep.mubr.msk.bf16.mxu1 %vm225_vm0, %v1214_v38 }
  0x34   :  { %436 = vperm.xlu1 %1193, %v374_v41   ;;  %431 = vperm.xlu0 %1192, %v373_v42  }
  0x38   :  { %539 = vperm.xlu1 %1193, %v358_v39   ;;  %534 = vperm.xlu0 %1192, %v357_v40  }
  0x39   :  { %291 = vmatmul.mubr.bf16.gmra.mrb[4].mxu0 %v1216_v43  ;;  %323 = vmatmul.mubr.bf16.gmra.mrb[4].mxu1 %v1217_v44 }
  0x3a   :  { %1072 = vmatprep.mubr.msk.bf16.mxu0 %vm225_vm0, %v1218_v45  ;;  %1076 = vmatprep.mubr.msk.bf16.mxu1 %vm225_vm0, %v1220_v46 }
  0x3c   :  { %446 = vperm.xlu1 %1193, %v376_v49   ;;  %441 = vperm.xlu0 %1192, %v375_v50  }
  0x40   :  { %549 = vperm.xlu1 %1193, %v360_v47   ;;  %544 = vperm.xlu0 %1192, %v359_v48  }
  0x41   :  { %299 = vmatmul.mubr.bf16.gmra.mrb[8].mxu0 %v1222_v51  ;;  %331 = vmatmul.mubr.bf16.gmra.mrb[8].mxu1 %v1223_v52 }
  0x42   :  { %1073 = vmatprep.mubr.msk.bf16.mxu0 %vm225_vm0, %v1224_v53  ;;  %1077 = vmatprep.mubr.msk.bf16.mxu1 %vm225_vm0, %v1226_v54 }
  0x44   :  { %456 = vperm.xlu1 %1193, %v378_v57   ;;  %451 = vperm.xlu0 %1192, %v377_v58  }
  0x48   :  { %559 = vperm.xlu1 %1193, %v362_v55   ;;  %554 = vperm.xlu0 %1192, %v361_v56  }
  0x49   :  { %307 = vmatmul.mubr.bf16.gmra.mrb[12].mxu0 %v1228_v59  ;;  %339 = vmatmul.mubr.bf16.gmra.mrb[12].mxu1 %v1229_v60 }
  0x84   :  { %v1533_v61 = vpop.permute.xlu1 %391  ;;  %v382_v62 = vpop.permute.xlu0 %381 }
  0x88   :  { %v1535_v63 = vpop.permute.xlu1 %396  ;;  %v387_v0 = vpop.permute.xlu0 %386 }
  0x8c   :  { %v490_v1 = vpop.permute.xlu1 %489  ;;  %v485_v2 = vpop.permute.xlu0 %484 }
  0x8d   :  { %v562_v31 = vmul.f32 %v1563_v22, %v485_v2  ;;  %v563_v45 = vmul.f32 %v1563_v22, %v490_v1 }
  0x90   :  { %v1537_v3 = vpop.permute.xlu1 %499  ;;  %v495_v4 = vpop.permute.xlu0 %494 }
  0x91   :  { %v564_v56 = vmul.f32 %v1563_v22, %v495_v4  ;;  %v565_v4 = vmul.f32 %v1563_v22, %v1537_v3 }
  0x9b   :  { %v1539_v5 = vpop.permute.xlu1 %406  ;;  %v1541_v6 = vpop.permute.xlu0 %401 }
  0x9f   :  { %v1543_v7 = vpop.permute.xlu1 %509  ;;  %v1545_v8 = vpop.permute.xlu0 %504 }
  0xa3   :  { %v1547_v9 = vpop.permute.xlu1 %416  ;;  %v1549_v10 = vpop.permute.xlu0 %411 }
  0xa7   :  { %v1551_v11 = vpop.permute.xlu1 %519  ;;  %v1553_v12 = vpop.permute.xlu0 %514 }
  0xab   :  { %v427_v13 = vpop.permute.xlu1 %426  ;;  %v422_v14 = vpop.permute.xlu0 %421 }
  0xaf   :  { %v530_v15 = vpop.permute.xlu1 %529  ;;  %v525_v16 = vpop.permute.xlu0 %524 }
  0xb0   :  { %v570_v32 = vmul.f32 %v1563_v22, %v525_v16  ;;  %v571_v48 = vmul.f32 %v1563_v22, %v530_v15 }
  0xb3   :  { %v437_v17 = vpop.permute.xlu1 %436  ;;  %v432_v18 = vpop.permute.xlu0 %431 }
  0xb7   :  { %v540_v19 = vpop.permute.xlu1 %539  ;;  %v535_v20 = vpop.permute.xlu0 %534 }
  0xb8   :  { %v572_v57 = vmul.f32 %v1563_v22, %v535_v20 }
  0xbb   :  { %v1565_v23 = vpop.permute.xlu1 %446  ;;  %v1567_v24 = vpop.permute.xlu0 %441 }
  0xbf   :  { %v550_v46 = vpop.permute.xlu1 %549  ;;  %v545_v47 = vpop.permute.xlu0 %544 }
 0x104   :  { %v284_v25 = vpop.f32.mrb[0].mxu0  ;;  %v316_v26 = vpop.f32.mrb[0].mxu1 }
 0x105   :  { %v285_v27 = vadd.f32 %v1558_v21, %v284_v25  ;;  %v317_v28 = vadd.f32 %v1558_v21, %v316_v26  ;;  %v286_v29 = vpop.f32.mrb[1].mxu0  ;;  %v318_v30 = vpop.f32.mrb[1].mxu1 }
 0x106   :  { %v287_v33 = vpop.f32.mrb[2].mxu0  ;;  %v319_v34 = vpop.f32.mrb[2].mxu1 }
 0x107   :  { %v459_v35 = vmul.f32 %v382_v62, %v285_v27  ;;  %v467_v36 = vmul.f32 %v422_v14, %v317_v28  ;;  %v288_v37 = vadd.f32 %v1558_v21, %v287_v33  ;;  %v320_v38 = vadd.f32 %v1558_v21, %v319_v34  ;;  %v289_v39 = vpop.f32.mrb[3].mxu0  ;;  %v321_v40 = vpop.f32.mrb[3].mxu1 }
 0x108   :  { %v1604_v25 = vpop.permute.xlu1 %456  ;;  %v452_v26 = vpop.permute.xlu0 %451  ;;  %v567_v33 = vmul.f32 %v1563_v22, %v1543_v7  ;;  %v566_v34 = vmul.f32 %v1563_v22, %v1545_v8 }
 0x109   :  { %v460_v41 = vmul.f32 %v387_v0, %v288_v37  ;;  %v1575_v42 = vadd.f32 %v570_v32, %v467_v36  ;;  %v1577_v43 = vadd.f32 %v562_v31, %v459_v35  ;;  %v468_v44 = vmul.f32 %v427_v13, %v320_v38 }
 0x10a   :  { %v575_v35 = vmul.f32 %v1563_v22, %v550_v46 }
 0x10b   :  { %725 = vadd.xlane.f32.xlu1 %v1575_v42  ;;  %709 = vadd.xlane.f32.xlu0 %v1577_v43  ;;  %v1585_v55 = vadd.f32 %v563_v45, %v460_v41  ;;  %v1589_v60 = vadd.f32 %v571_v48, %v468_v44 }
 0x10c   :  { %v292_v49 = vpop.f32.mrb[4].mxu0  ;;  %v324_v50 = vpop.f32.mrb[4].mxu1 }
 0x10d   :  { %v293_v51 = vadd.f32 %v1558_v21, %v292_v49  ;;  %v325_v52 = vadd.f32 %v1558_v21, %v324_v50  ;;  %v294_v53 = vpop.f32.mrb[5].mxu0  ;;  %v326_v54 = vpop.f32.mrb[5].mxu1  ;;  %v594_v3 = vadd.f32 %v1585_v55, %v1577_v43  ;;  %v626_v7 = vadd.f32 %v1589_v60, %v1575_v42 }
 0x10e   :  { %v295_v58 = vpop.f32.mrb[6].mxu0  ;;  %v327_v59 = vpop.f32.mrb[6].mxu1 }
 0x10f   :  { %v461_v62 = vmul.f32 %v1533_v61, %v293_v51  ;;  %v469_v0 = vmul.f32 %v432_v18, %v325_v52  ;;  %v296_v1 = vadd.f32 %v1558_v21, %v295_v58  ;;  %v328_v2 = vadd.f32 %v1558_v21, %v327_v59  ;;  %v297_v13 = vpop.f32.mrb[7].mxu0  ;;  %711 = vadd.xlane.f32.xlu1 %v1585_v55  ;;  %v329_v14 = vpop.f32.mrb[7].mxu1 }
 0x110   :  { %727 = vadd.xlane.f32.xlu0 %v1589_v60  ;;  %v573_v18 = vmul.f32 %v1563_v22, %v540_v19  ;;  %v595_v48 = vrot.slane %v594_v3, 4  ;;  %v560_v52 = vpop.permute.xlu1 %559  ;;  %v555_v53 = vpop.permute.xlu0 %554 }
 0x111   :  { %v462_v15 = vmul.f32 %v1535_v63, %v296_v1  ;;  %v470_v16 = vmul.f32 %v437_v17, %v328_v2  ;;  %v1599_v20 = vadd.f32 %v572_v57, %v469_v0  ;;  %v1601_v61 = vadd.f32 %v564_v56, %v461_v62 }
 0x112   :  { %v596_v58 = vadd.f32 %v595_v48, %v594_v3 }
 0x113   :  { %729 = vadd.xlane.f32.xlu1 %v1599_v20  ;;  %v1607_v27 = vadd.f32 %v565_v4, %v462_v15  ;;  %v1612_v28 = vadd.f32 %v573_v18, %v470_v16  ;;  %v577_v15 = vmul.f32 %v1563_v22, %v560_v52  ;;  %v576_v16 = vmul.f32 %v1563_v22, %v555_v53 }
 0x114   :  { %713 = vadd.xlane.f32.xlu0 %v1601_v61  ;;  %v300_v63 = vpop.f32.mrb[8].mxu0  ;;  %v332_v17 = vpop.f32.mrb[8].mxu1 }
 0x115   :  { %v301_v29 = vadd.f32 %v1558_v21, %v300_v63  ;;  %v333_v19 = vadd.f32 %v1558_v21, %v332_v17  ;;  %v302_v30 = vpop.f32.mrb[9].mxu0  ;;  %v334_v31 = vpop.f32.mrb[9].mxu1  ;;  %v602_v32 = vadd.f32 %v1607_v27, %v1601_v61  ;;  %v634_v8 = vadd.f32 %v1612_v28, %v1599_v20 }
 0x116   :  { %v303_v36 = vpop.f32.mrb[10].mxu0  ;;  %v335_v37 = vpop.f32.mrb[10].mxu1 }
 0x117   :  { %v463_v38 = vmul.f32 %v1541_v6, %v301_v29  ;;  %v471_v39 = vmul.f32 %v1567_v24, %v333_v19  ;;  %v304_v40 = vadd.f32 %v1558_v21, %v303_v36  ;;  %v336_v41 = vadd.f32 %v1558_v21, %v335_v37  ;;  %v305_v44 = vpop.f32.mrb[11].mxu0  ;;  %v337_v45 = vpop.f32.mrb[11].mxu1 }
 0x118   :  { %v603_v49 = vrot.slane %v602_v32, 4  ;;  %715 = vadd.xlane.f32.xlu0 %v1607_v27  ;;  %v574_v6 = vmul.f32 %v1563_v22, %v545_v47  ;;  %v569_v47 = vmul.f32 %v1563_v22, %v1551_v11  ;;  %v635_v59 = vrot.slane %v634_v8, 4 }
 0x119   :  { %v464_v24 = vmul.f32 %v1539_v5, %v304_v40  ;;  %v472_v46 = vmul.f32 %v1565_v23, %v336_v41  ;;  %v1635_v50 = vadd.f32 %v566_v34, %v463_v38  ;;  %v627_v5 = vrot.slane %v626_v7, 4 }
 0x11a   :  { %v604_v51 = vadd.f32 %v603_v49, %v602_v32  ;;  %v1638_v54 = vadd.f32 %v574_v6, %v471_v39  ;;  %v568_v11 = vmul.f32 %v1563_v22, %v1553_v12 }
 0x11b   :  { %717 = vadd.xlane.f32.xlu1 %v1635_v50  ;;  %v1640_v56 = vadd.f32 %v567_v33, %v464_v24  ;;  %v1642_v57 = vadd.f32 %v575_v35, %v472_v46  ;;  %v597_v33 = vrot.slane %v596_v58, 2  ;;  %v628_v12 = vadd.f32 %v627_v5, %v626_v7 }
 0x11c   :  { %731 = vadd.xlane.f32.xlu0 %v1612_v28  ;;  %v308_v23 = vpop.f32.mrb[12].mxu0  ;;  %v340_v62 = vpop.f32.mrb[12].mxu1  ;;  %v605_v18 = vrot.slane %v604_v51, 2  ;;  %v636_v35 = vadd.f32 %v635_v59, %v634_v8 }
 0x11d   :  { %v309_v0 = vadd.f32 %v1558_v21, %v308_v23  ;;  %v341_v1 = vadd.f32 %v1558_v21, %v340_v62  ;;  %v310_v2 = vpop.f32.mrb[13].mxu0  ;;  %v342_v13 = vpop.f32.mrb[13].mxu1  ;;  %v610_v14 = vadd.f32 %v1640_v56, %v1635_v50  ;;  %v642_v4 = vadd.f32 %v1642_v57, %v1638_v54 }
 0x11e   :  { %v311_v3 = vpop.f32.mrb[14].mxu0  ;;  %v343_v63 = vpop.f32.mrb[14].mxu1  ;;  %v629_v44 = vrot.slane %v628_v12, 2  ;;  %v637_v48 = vrot.slane %v636_v35, 2 }
 0x11f   :  { %v465_v17 = vmul.f32 %v1549_v10, %v309_v0  ;;  %v473_v29 = vmul.f32 %v452_v26, %v341_v1  ;;  %v312_v19 = vadd.f32 %v1558_v21, %v311_v3  ;;  %v344_v30 = vadd.f32 %v1558_v21, %v343_v63  ;;  %v313_v31 = vpop.f32.mrb[15].mxu0  ;;  %733 = vadd.xlane.f32.xlu1 %v1638_v54  ;;  %v345_v32 = vpop.f32.mrb[15].mxu1 }
 0x120   :  { %v611_v34 = vrot.slane %v610_v14, 4  ;;  %719 = vadd.xlane.f32.xlu0 %v1640_v56  ;;  %v643_v22 = vrot.slane %v642_v4, 4  ;;  %v606_v21 = vadd.f32 %v605_v18, %v604_v51  ;;  %v630_v51 = vadd.f32 %v629_v44, %v628_v12 }
 0x121   :  { %v466_v36 = vmul.f32 %v1547_v9, %v312_v19  ;;  %v474_v10 = vmul.f32 %v1604_v25, %v344_v30  ;;  %v1664_v26 = vadd.f32 %v568_v11, %v465_v17  ;;  %v1667_v39 = vadd.f32 %v576_v16, %v473_v29 }
 0x122   :  { %v612_v37 = vadd.f32 %v611_v34, %v610_v14  ;;  %v644_v38 = vadd.f32 %v643_v22, %v642_v4  ;;  %v598_v9 = vadd.f32 %v597_v33, %v596_v58  ;;  %v607_v6 = vrot.slane %v606_v21, 1 }
 0x123   :  { %721 = vadd.xlane.f32.xlu1 %v1664_v26  ;;  %v1669_v40 = vadd.f32 %v569_v47, %v466_v36  ;;  %v1671_v41 = vadd.f32 %v577_v15, %v474_v10  ;;  %v638_v47 = vadd.f32 %v637_v48, %v636_v35  ;;  %v631_v1 = vrot.slane %v630_v51, 1 }
 0x124   :  { %v613_v45 = vrot.slane %v612_v37, 2  ;;  %735 = vadd.xlane.f32.xlu0 %v1642_v57  ;;  %v645_v8 = vrot.slane %v644_v38, 2  ;;  %v599_v53 = vrot.slane %v598_v9, 1  ;;  %v608_v23 = vadd.f32 %v607_v6, %v606_v21  ;;  %v1079_v21 = vld [vmem:[%s1862_s5] ss:$0 sm:$0xff] }
 0x125   :  { %v618_v25 = vadd.f32 %v1669_v40, %v1664_v26  ;;  %v650_v7 = vadd.f32 %v1671_v41, %v1667_v39  ;;  %v639_v4 = vrot.slane %v638_v47, 1  ;;  %v632_v17 = vadd.f32 %v631_v1, %v630_v51 }
 0x126   :  { %v614_v49 = vadd.f32 %v613_v45, %v612_v37  ;;  %v646_v59 = vadd.f32 %v645_v8, %v644_v38  ;;  %v600_v13 = vadd.f32 %v599_v53, %v598_v9  ;;  %v609_v16 = vmul.f32 0.0625, %v608_v23 }
 0x127   :  { %737 = vadd.xlane.f32.xlu1 %v1667_v39  ;;  %v619_v24 = vrot.slane %v618_v25, 4  ;;  %v651_v46 = vrot.slane %v650_v7, 4  ;;  %v640_v30 = vadd.f32 %v639_v4, %v638_v47  ;;  %v633_v34 = vmul.f32 0.0625, %v632_v17 }
 0x128   :  { %v615_v52 = vrot.slane %v614_v49, 1  ;;  %723 = vadd.xlane.f32.xlu0 %v1669_v40  ;;  %v647_v15 = vrot.slane %v646_v59, 1  ;;  %v601_v29 = vmul.f32 0.0625, %v600_v13 }
 0x129   :  { %v620_v58 = vadd.f32 %v619_v24, %v618_v25  ;;  %v652_v5 = vadd.f32 %v651_v46, %v650_v7  ;;  %v641_v35 = vmul.f32 0.0625, %v640_v30 }
 0x12a   :  { %v616_v2 = vadd.f32 %v615_v52, %v614_v49  ;;  %v648_v31 = vadd.f32 %v647_v15, %v646_v59  ;;  %v660_v12 = vsel %vm659_vm1, %v601_v29, %v609_v16 }
 0x12b   :  { %v621_v62 = vrot.slane %v620_v58, 2  ;;  %v653_v0 = vrot.slane %v652_v5, 2 }
 0x12c   :  { %739 = vadd.xlane.f32.xlu0 %v1671_v41  ;;  %v617_v63 = vmul.f32 0.0625, %v616_v2  ;;  %v649_v10 = vmul.f32 0.0625, %v648_v31 }
 0x12d   :  { %v622_v14 = vadd.f32 %v621_v62, %v620_v58  ;;  %v654_v11 = vadd.f32 %v653_v0, %v652_v5 }
 0x12e   :  { %v662_v22 = vsel %vm661_vm2, %v660_v12, %v617_v63 }
 0x12f   :  { %v623_v18 = vrot.slane %v622_v14, 1  ;;  %v655_v3 = vrot.slane %v654_v11, 1 }
 0x131   :  { %v624_v19 = vadd.f32 %v623_v18, %v622_v14  ;;  %v656_v33 = vadd.f32 %v655_v3, %v654_v11 }
 0x133   :  { %v625_v32 = vmul.f32 0.0625, %v624_v19  ;;  %v657_v38 = vmul.f32 0.0625, %v656_v33 }
 0x135   :  { %v664_v36 = vsel %vm663_vm3, %v662_v22, %v625_v32 }
 0x136   :  { %v666_v37 = vsel %vm665_vm4, %v664_v36, %v633_v34 }
 0x137   :  { %v668_v44 = vsel %vm667_vm5, %v666_v37, %v641_v35 }
 0x138   :  { %v670_v45 = vsel %vm669_vm6, %v668_v44, %v649_v10 }
 0x139   :  { %v672_v9 = vsel %vm671_vm7, %v670_v45, %v657_v38 }
 0x13a   :  { %v1684_v48 = vadd.f32 %v1079_v21, %v672_v9 }
 0x13c   :  { %680 = vadd.xlane.f32.xlu1 %v1684_v48 }
 0x198   :  { %v726_v25 = vpop.xlane.xlu1 %725  ;;  %v710_v7 = vpop.xlane.xlu0 %709 }
 0x199   :  { %v749_v49 = vmul.f32 0.0078125, %v726_v25  ;;  %v741_v8 = vmul.f32 0.0078125, %v710_v7 }
 0x19b   :  { %v1688_v6 = vsub.f32 %v1577_v43, %v741_v8  ;;  %v1691_v46 = vsub.f32 %v1575_v42, %v749_v49 }
 0x19c   :  { %v712_v24 = vpop.xlane.xlu1 %711 }
 0x19d   :  { %v742_v51 = vmul.f32 0.0078125, %v712_v24  ;;  %v728_v52 = vpop.xlane.xlu0 %727  ;;  %v773_v53 = vmul.f32 %v1688_v6, %v1688_v6  ;;  %v781_v23 = vmul.f32 %v1691_v46, %v1691_v46 }
 0x19e   :  { %v750_v47 = vmul.f32 0.0078125, %v728_v52 }
 0x19f   :  { %v1696_v58 = vsub.f32 %v1585_v55, %v742_v51  ;;  %789 = vadd.xlane.f32.xlu0 %v773_v53 }
 0x1a0   :  { %v730_v5 = vpop.xlane.xlu1 %729  ;;  %v1699_v59 = vsub.f32 %v1589_v60, %v750_v47 }
 0x1a1   :  { %v714_v43 = vpop.xlane.xlu0 %713  ;;  %v774_v42 = vmul.f32 %v1696_v58, %v1696_v58  ;;  %v751_v62 = vmul.f32 0.0078125, %v730_v5 }
 0x1a2   :  { %v743_v0 = vmul.f32 0.0078125, %v714_v43  ;;  %v782_v2 = vmul.f32 %v1699_v59, %v1699_v59 }
 0x1a3   :  { %805 = vadd.xlane.f32.xlu0 %v781_v23  ;;  %791 = vadd.xlane.f32.xlu1 %v774_v42  ;;  %v1711_v60 = vsub.f32 %v1599_v20, %v751_v62 }
 0x1a4   :  { %v1706_v1 = vsub.f32 %v1601_v61, %v743_v0 }
 0x1a5   :  { %v716_v55 = vpop.xlane.xlu0 %715  ;;  %v783_v18 = vmul.f32 %v1711_v60, %v1711_v60 }
 0x1a6   :  { %v744_v13 = vmul.f32 0.0078125, %v716_v55  ;;  %v775_v14 = vmul.f32 %v1706_v1, %v1706_v1 }
 0x1a7   :  { %807 = vadd.xlane.f32.xlu1 %v782_v2 }
 0x1a8   :  { %v1716_v4 = vsub.f32 %v1607_v27, %v744_v13  ;;  %793 = vadd.xlane.f32.xlu0 %v775_v14  ;;  %v718_v11 = vpop.xlane.xlu1 %717 }
 0x1a9   :  { %v745_v15 = vmul.f32 0.0078125, %v718_v11  ;;  %v732_v61 = vpop.xlane.xlu0 %731 }
 0x1aa   :  { %v752_v16 = vmul.f32 0.0078125, %v732_v61  ;;  %v776_v20 = vmul.f32 %v1716_v4, %v1716_v4 }
 0x1ab   :  { %v1723_v3 = vsub.f32 %v1635_v50, %v745_v15 }
 0x1ac   :  { %v1726_v63 = vsub.f32 %v1612_v28, %v752_v16  ;;  %809 = vadd.xlane.f32.xlu0 %v783_v18  ;;  %795 = vadd.xlane.f32.xlu1 %v776_v20  ;;  %v734_v27 = vpop.xlane.xlu1 %733 }
 0x1ad   :  { %v753_v17 = vmul.f32 0.0078125, %v734_v27  ;;  %v720_v29 = vpop.xlane.xlu0 %719  ;;  %v777_v19 = vmul.f32 %v1723_v3, %v1723_v3 }
 0x1ae   :  { %v746_v30 = vmul.f32 0.0078125, %v720_v29  ;;  %v784_v31 = vmul.f32 %v1726_v63, %v1726_v63 }
 0x1af   :  { %v1733_v32 = vsub.f32 %v1638_v54, %v753_v17 }
 0x1b0   :  { %v1736_v50 = vsub.f32 %v1640_v56, %v746_v30  ;;  %797 = vadd.xlane.f32.xlu0 %v777_v19  ;;  %811 = vadd.xlane.f32.xlu1 %v784_v31  ;;  %v722_v28 = vpop.xlane.xlu1 %721  ;;  %v1776_v30 = vld [vmem:[%s1863_s6] ss:$0 sm:$0xff]  ;;  %s1313_s6 = smov [#allocation2]  }
 0x1b1   :  { %v747_v33 = vmul.f32 0.0078125, %v722_v28  ;;  %v736_v12 = vpop.xlane.xlu0 %735  ;;  %v785_v34 = vmul.f32 %v1733_v32, %v1733_v32 }
 0x1b2   :  { %v754_v22 = vmul.f32 0.0078125, %v736_v12  ;;  %v778_v35 = vmul.f32 %v1736_v50, %v1736_v50 }
 0x1b3   :  { %v1743_v36 = vsub.f32 %v1664_v26, %v747_v33 }
 0x1b4   :  { %v1746_v54 = vsub.f32 %v1642_v57, %v754_v22  ;;  %813 = vadd.xlane.f32.xlu0 %v785_v34  ;;  %799 = vadd.xlane.f32.xlu1 %v778_v35  ;;  %v738_v56 = vpop.xlane.xlu1 %737 }
 0x1b5   :  { %v755_v10 = vmul.f32 0.0078125, %v738_v56  ;;  %v724_v37 = vpop.xlane.xlu0 %723  ;;  %v779_v38 = vmul.f32 %v1743_v36, %v1743_v36 }
 0x1b6   :  { %v748_v21 = vmul.f32 0.0078125, %v724_v37  ;;  %v786_v44 = vmul.f32 %v1746_v54, %v1746_v54 }
 0x1b7   :  { %v1753_v45 = vsub.f32 %v1667_v39, %v755_v10 }
 0x1b8   :  { %v1756_v26 = vsub.f32 %v1669_v40, %v748_v21  ;;  %801 = vadd.xlane.f32.xlu0 %v779_v38  ;;  %815 = vadd.xlane.f32.xlu1 %v786_v44  ;;  %v1784_v38 = vld [vmem:[%s1864_s7] ss:$0 sm:$0xff]  ;;  %s1016_s7 = sshll.u32 %s1313_s6, 4  ;;  %s1017_s7 = int_to_ptr.vmem [resolvable:$true] %s1016_s7 }
 0x1b9   :  { %v740_v57 = vpop.xlane.xlu0 %739  ;;  %v787_v9 = vmul.f32 %v1753_v45, %v1753_v45  ;;  %s1264_s16 = scalar_lea.vmem %s1017_s7, 1024  ;;  %p1269_p1 = scmp.lt.s32.totalorder %s1017_s7, %s1017_s7 }
 0x1ba   :  { %v756_v25 = vmul.f32 0.0078125, %v740_v57  ;;  %v780_v7 = vmul.f32 %v1756_v26, %v1756_v26  ;;  %p1265_p0 = scmp.ne.s32.totalorder %s1017_s7, %s1264_s16  ;;  %p1270_p2 = scmp.lt.s32.totalorder %s1264_s16, %s1264_s16 }
 0x1bc   :  { %v1763_v49 = vsub.f32 %v1671_v41, %v756_v25  ;;  %817 = vadd.xlane.f32.xlu0 %v787_v9  ;;  %803 = vadd.xlane.f32.xlu1 %v780_v7  ;;  %p1271_p3 = por %p1270_p2, %p1269_p1 }
 0x1be   :  { %v788_v39 = vmul.f32 %v1763_v49, %v1763_v49  ;;  %p1272_p4 = pnand %p1271_p3, %p1265_p0 }
 0x1c0   :  { %819 = vadd.xlane.f32.xlu1 %v788_v39 }
 0x1c9   :  { %v681_v40 = vpop.xlane.xlu1 %680 }
 0x1ca   :  { %v683_v8 = vmul.f32 0.0078125, %v681_v40 }
 0x1cc   :  { %v1768_v24 = vsub.f32 %v1684_v48, %v683_v8 }
 0x1ce   :  { %v685_v51 = vmul.f32 %v1768_v24, %v1768_v24 }
 0x1d0   :  { %686 = vadd.xlane.f32.xlu0 %v685_v51 }
 0x22c   :  { %v790_v52 = vpop.xlane.xlu0 %789 }
 0x22d   :  { %v821_v53 = vmul.f32 0.0078125, %v790_v52 }
 0x22f   :  { %v837_v47 = vadd.f32 1e-06, %v821_v53 }
 0x230   :  { %v806_v41 = vpop.xlane.xlu0 %805  ;;  %v792_v5 = vpop.xlane.xlu1 %791 }
 0x231   :  { %1230 = vrsqrt.f32 %v837_v47  ;;  %v829_v43 = vmul.f32 0.0078125, %v806_v41  ;;  %v822_v23 = vmul.f32 0.0078125, %v792_v5 }
 0x233   :  { %v845_v42 = vadd.f32 1e-06, %v829_v43  ;;  %v838_v62 = vadd.f32 1e-06, %v822_v23 }
 0x234   :  { %v808_v0 = vpop.xlane.xlu1 %807 }
 0x235   :  { %1232 = vrsqrt.f32 %v845_v42  ;;  %v794_v55 = vpop.xlane.xlu0 %793  ;;  %v830_v2 = vmul.f32 0.0078125, %v808_v0 }
 0x236   :  { %1234 = vrsqrt.f32 %v838_v62  ;;  %v823_v48 = vmul.f32 0.0078125, %v794_v55 }
 0x237   :  { %v846_v13 = vadd.f32 1e-06, %v830_v2 }
 0x238   :  { %v839_v14 = vadd.f32 1e-06, %v823_v48 }
 0x239   :  { %1236 = vrsqrt.f32 %v846_v13  ;;  %v810_v11 = vpop.xlane.xlu0 %809  ;;  %v796_v15 = vpop.xlane.xlu1 %795 }
 0x23a   :  { %1238 = vrsqrt.f32 %v839_v14  ;;  %v831_v61 = vmul.f32 0.0078125, %v810_v11  ;;  %v824_v16 = vmul.f32 0.0078125, %v796_v15 }
 0x23b   :  { %v1231_v18 = vpop.eup %1230 }
 0x23c   :  { %v847_v20 = vadd.f32 1e-06, %v831_v61  ;;  %v840_v27 = vadd.f32 1e-06, %v824_v16  ;;  %v869_v17 = vmul.f32 %v1231_v18, %v1688_v6 }
 0x23d   :  { %v798_v29 = vpop.xlane.xlu0 %797  ;;  %v812_v19 = vpop.xlane.xlu1 %811 }
 0x23e   :  { %1240 = vrsqrt.f32 %v847_v20  ;;  %v825_v31 = vmul.f32 0.0078125, %v798_v29  ;;  %v832_v28 = vmul.f32 0.0078125, %v812_v19  ;;  %v892_v56 = vmul.f32 %v1776_v30, %v869_v17 }
 0x23f   :  { %v1233_v33 = vpop.eup %1232  ;;  %1242 = vrsqrt.f32 %v840_v27 }
 0x240   :  { %v1235_v12 = vpop.eup %1234  ;;  %v877_v34 = vmul.f32 %v1233_v33, %v1691_v46  ;;  %v841_v22 = vadd.f32 1e-06, %v825_v31  ;;  %v848_v35 = vadd.f32 1e-06, %v832_v28  ;;  %v915_v40 = vadd.f32 %v1784_v38, %v892_v56 }
 0x241   :  { %v870_v6 = vmul.f32 %v1235_v12, %v1696_v58  ;;  %v814_v10 = vpop.xlane.xlu0 %813  ;;  %v800_v37 = vpop.xlane.xlu1 %799 }
 0x242   :  { %1244 = vrsqrt.f32 %v841_v22  ;;  %v833_v21 = vmul.f32 0.0078125, %v814_v10  ;;  %v826_v44 = vmul.f32 0.0078125, %v800_v37  ;;  %v900_v25 = vmul.f32 %v1776_v30, %v877_v34 }
 0x243   :  { %v1237_v57 = vpop.eup %1236  ;;  %v893_v9 = vmul.f32 %v1776_v30, %v870_v6  ;;  %1246 = vrsqrt.f32 %v848_v35 }
 0x244   :  { %v1239_v46 = vpop.eup %1238  ;;  %v878_v7 = vmul.f32 %v1237_v57, %v1699_v59  ;;  %v849_v58 = vadd.f32 1e-06, %v833_v21  ;;  %v842_v39 = vadd.f32 1e-06, %v826_v44  ;;  %v923_v59 = vadd.f32 %v1784_v38, %v900_v25 }
 0x245   :  { %v916_v8 = vadd.f32 %v1784_v38, %v893_v9  ;;  %v871_v51 = vmul.f32 %v1239_v46, %v1706_v1  ;;  %v802_v52 = vpop.xlane.xlu0 %801  ;;  %v816_v53 = vpop.xlane.xlu1 %815 }
 0x246   :  { %v901_v47 = vmul.f32 %v1776_v30, %v878_v7  ;;  %1248 = vrsqrt.f32 %v849_v58  ;;  %v827_v41 = vmul.f32 0.0078125, %v802_v52  ;;  %v834_v5 = vmul.f32 0.0078125, %v816_v53 }
 0x247   :  { %v1119_v43 = vpack.c.bf16 %v916_v8, %v915_v40  ;;  %1250 = vrsqrt.f32 %v842_v39  ;;  %v894_v1 = vmul.f32 %v1776_v30, %v871_v51 }
 0x248   :  { %v1241_v23 = vpop.eup %1240  ;;  %v924_v42 = vadd.f32 %v1784_v38, %v901_v47  ;;  %v843_v62 = vadd.f32 1e-06, %v827_v41  ;;  %v850_v0 = vadd.f32 1e-06, %v834_v5 }
 0x249   :  { %v1243_v55 = vpop.eup %1242  ;;  %1120 = vst [vmem:[#allocation2] sm:$0xff] %v1119_v43   ;;  %v879_v2 = vmul.f32 %v1241_v23, %v1711_v60  ;;  %v818_v48 = vpop.xlane.xlu0 %817  ;;  %v917_v17 = vadd.f32 %v1784_v38, %v894_v1 }
 0x24a   :  { %v804_v13 = vpop.xlane.xlu1 %803  ;;  %v1139_v14 = vpack.c.bf16 %v924_v42, %v923_v59  ;;  %v872_v11 = vmul.f32 %v1243_v55, %v1716_v4  ;;  %1252 = vrsqrt.f32 %v843_v62  ;;  %v835_v15 = vmul.f32 0.0078125, %v818_v48 }
 0x24b   :  { %1254 = vrsqrt.f32 %v850_v0  ;;  %v828_v61 = vmul.f32 0.0078125, %v804_v13  ;;  %v902_v29 = vmul.f32 %v1776_v30, %v879_v2 }
 0x24c   :  { %v1245_v16 = vpop.eup %1244  ;;  %1159 = vst [vmem:[#allocation2 + $0x20] sm:$0xff] %v1139_v14   ;;  %v895_v18 = vmul.f32 %v1776_v30, %v872_v11  ;;  %v851_v20 = vadd.f32 1e-06, %v835_v15 }
 0x24d   :  { %v1247_v27 = vpop.eup %1246  ;;  %v873_v60 = vmul.f32 %v1245_v16, %v1723_v3  ;;  %v844_v19 = vadd.f32 1e-06, %v828_v61  ;;  %v925_v6 = vadd.f32 %v1784_v38, %v902_v29 }
 0x24e   :  { %v820_v31 = vpop.xlane.xlu1 %819  ;;  %v918_v4 = vadd.f32 %v1784_v38, %v895_v18  ;;  %v880_v28 = vmul.f32 %v1247_v27, %v1726_v63  ;;  %1256 = vrsqrt.f32 %v851_v20 }
 0x24f   :  { %v836_v33 = vmul.f32 0.0078125, %v820_v31  ;;  %1258 = vrsqrt.f32 %v844_v19  ;;  %v896_v10 = vmul.f32 %v1776_v30, %v873_v60 }
 0x250   :  { %v1249_v12 = vpop.eup %1248  ;;  %v1124_v34 = vpack.c.bf16 %v918_v4, %v917_v17  ;;  %v903_v22 = vmul.f32 %v1776_v30, %v880_v28 }
 0x251   :  { %v852_v35 = vadd.f32 1e-06, %v836_v33  ;;  %v1251_v56 = vpop.eup %1250  ;;  %v881_v37 = vmul.f32 %v1249_v12, %v1733_v32  ;;  %v919_v46 = vadd.f32 %v1784_v38, %v896_v10 }
 0x252   :  { %1156 = vst [vmem:[#allocation2 + $0x8] sm:$0xff] %v1124_v34   ;;  %v926_v3 = vadd.f32 %v1784_v38, %v903_v22  ;;  %v874_v63 = vmul.f32 %v1251_v56, %v1736_v50 }
 0x253   :  { %1260 = vrsqrt.f32 %v852_v35  ;;  %v904_v25 = vmul.f32 %v1776_v30, %v881_v37 }
 0x254   :  { %v1253_v21 = vpop.eup %1252  ;;  %v1144_v44 = vpack.c.bf16 %v926_v3, %v925_v6  ;;  %v897_v57 = vmul.f32 %v1776_v30, %v874_v63 }
 0x255   :  { %v1255_v9 = vpop.eup %1254  ;;  %v875_v58 = vmul.f32 %v1253_v21, %v1743_v36  ;;  %v927_v52 = vadd.f32 %v1784_v38, %v904_v25 }
 0x256   :  { %1160 = vst [vmem:[#allocation2 + $0x28] sm:$0xff] %v1144_v44   ;;  %v920_v7 = vadd.f32 %v1784_v38, %v897_v57  ;;  %v882_v39 = vmul.f32 %v1255_v9, %v1746_v54 }
 0x257   :  { %v898_v53 = vmul.f32 %v1776_v30, %v875_v58 }
 0x258   :  { %v1257_v32 = vpop.eup %1256  ;;  %v1129_v40 = vpack.c.bf16 %v920_v7, %v919_v46  ;;  %v905_v50 = vmul.f32 %v1776_v30, %v882_v39 }
 0x259   :  { %v1259_v8 = vpop.eup %1258  ;;  %v883_v51 = vmul.f32 %v1257_v32, %v1753_v45  ;;  %v921_v45 = vadd.f32 %v1784_v38, %v898_v53 }
 0x25a   :  { %1157 = vst [vmem:[#allocation2 + $0x10] sm:$0xff] %v1129_v40   ;;  %v928_v47 = vadd.f32 %v1784_v38, %v905_v50  ;;  %v876_v41 = vmul.f32 %v1259_v8, %v1756_v26 }
 0x25b   :  { %v906_v43 = vmul.f32 %v1776_v30, %v883_v51 }
 0x25c   :  { %v1149_v36 = vpack.c.bf16 %v928_v47, %v927_v52  ;;  %v899_v54 = vmul.f32 %v1776_v30, %v876_v41 }
 0x25d   :  { %v1261_v5 = vpop.eup %1260  ;;  %v687_v59 = vpop.xlane.xlu0 %686  ;;  %v929_v26 = vadd.f32 %v1784_v38, %v906_v43 }
 0x25e   :  { %v884_v23 = vmul.f32 %v1261_v5, %v1763_v49  ;;  %1161 = vst [vmem:[#allocation2 + $0x30] sm:$0xff] %v1149_v36   ;;  %v922_v42 = vadd.f32 %v1784_v38, %v899_v54  ;;  %v688_v62 = vmul.f32 0.0078125, %v687_v59 }
 0x260   :  { %v907_v0 = vmul.f32 %v1776_v30, %v884_v23  ;;  %v1134_v55 = vpack.c.bf16 %v922_v42, %v921_v45  ;;  %v689_v1 = vadd.f32 1e-06, %v688_v62 }
 0x262   :  { %v930_v2 = vadd.f32 %v1784_v38, %v907_v0  ;;  %1158 = vst [vmem:[#allocation2 + $0x18] sm:$0xff] %v1134_v55   ;;  %1262 = vrsqrt.f32 %v689_v1 }
 0x264   :  { %v1154_v49 = vpack.c.bf16 %v930_v2, %v929_v26 }
 0x266   :  { %1162 = vst [vmem:[#allocation2 + $0x38] sm:$0xff] %v1154_v49  }
 0x267   :  { %1275 = shalt.err (!%p1272_p4)
}
 0x268   :  { %s1276_s19 = scalar_lea.hbm %s1865_s8, 1024 }
 0x269   :  { %p1277_p5 = scmp.ne.s32.totalorder %s1865_s8, %s1276_s19  ;;  %p1280_p6 = scmp.lt.u32.totalorder %s1276_s19, %s1865_s8 }
 0x26b   :  { %p1282_p7 = pnand %p1280_p6, %p1277_p5 }
 0x26d   :  { %1285 = shalt.err (!%p1282_p7)
}
 0x26e   :  { %s1314_s23 = smov 64   ;;  %s1315_s24 = smov 4   ;;  %v1263_v48 = vpop.eup %1262 }
 0x26f   :  { %1022 = dma.vmem_to_hbm [thread:$0]  %s1017_s7, 1024, %s1865_s8, [#allocation3], %s1314_s23, %s1314_s23, %s1315_s24   ;;  %v691_v13 = vmul.f32 %v1263_v48, %v1768_v24 }
 0x270   :  { %s1316_s27 = smov [#allocation4]  }
 0x271   :  { %s1029_s28 = sshll.u32 %s1316_s27, 4  ;;  %v699_v14 = vmul.f32 %v1776_v30, %v691_v13  ;;  %s1030_s28 = int_to_ptr.vmem [resolvable:$true] %s1029_s28 }
 0x272   :  { %s1286_s29 = scalar_lea.vmem %s1030_s28, 128  ;;  %p1291_p9 = scmp.lt.s32.totalorder %s1030_s28, %s1030_s28 }
 0x273   :  { %v707_v11 = vadd.f32 %v1784_v38, %v699_v14  ;;  %p1287_p8 = scmp.ne.s32.totalorder %s1030_s28, %s1286_s29  ;;  %p1292_p10 = scmp.lt.s32.totalorder %s1286_s29, %s1286_s29 }
 0x275   :  { %708 = vst [vmem:[#allocation4] sm:$0xff] %v707_v11  ;;  %p1293_p11 = por %p1292_p10, %p1291_p9 }
 0x277   :  { %p1294_p12 = pnand %p1293_p11, %p1287_p8 }
 0x279   :  { %1297 = shalt.err (!%p1294_p12)
}
 0x27a   :  { %s1298_s10 = scalar_lea.hbm %s1866_s9, 128 }
 0x27b   :  { %p1299_p13 = scmp.ne.s32.totalorder %s1866_s9, %s1298_s10  ;;  %p1302_p0 = scmp.lt.u32.totalorder %s1298_s10, %s1866_s9 }
 0x27d   :  { %p1304_p1 = pnand %p1302_p0, %p1299_p13 }
 0x27f   :  { %1307 = shalt.err (!%p1304_p1)
}
 0x280   :  { %1032 = dma.vmem_to_hbm [thread:$0]  %s1030_s28, 128, %s1866_s9, [#allocation5]  }
 0x281   :  { %1308 = dma.done.wait [#allocation3], 1024  }
 0x282   :  { %1309 = vsyncadd [#allocation3], 4294966272 }
 0x283   :  { %1310 = dma.done.wait [#allocation5], 128  }
 0x284   :  { %1311 = vsyncadd [#allocation5], 4294967168 }
 0x285   :  { %1039 = vsyncpa [#allocation3], 1 }
 0x286   :  { %1040 = vsyncpa [#allocation5], 1 }

</bundles_post_ra>
